<compile_context>
chip_gen: v7x
topology: tpu7x:2x2x1
jax: 0.10.0
libtpu: 0.0.40
codegen_flags: <defaults>
</compile_context>

<pallas_src>
import numpy as np
import jax
import jax.numpy as jnp
from jax.experimental import pallas as pl
from jax.experimental.pallas import tpu as pltpu

LANE = 128        # TPU lane width
SUB = 8           # TPU sublane granularity
_NEG = -1e30      # additive mask for padded softmax / log-softmax lanes
_BN_EPS = 1e-5
_NORM_EPS = 1e-12  # F.normalize(p=1) eps
# Raise the scoped-VMEM limit above the 16 MiB (v5e) / 32 MiB (v6e, v7x) defaults so large
# super-blocks fit, while staying under v7x's 64 MiB physical VMEM with headroom.
_VMEM_LIMIT = 48 * 1024 * 1024


def _rup(x, m):
    return ((x + m - 1) // m) * m


def _pad2(a, rows, cols, fill=0.0):
    a = jnp.asarray(a, jnp.float32)
    r, c = a.shape
    return jnp.pad(a, ((0, rows - r), (0, cols - c)), constant_values=fill)


# ---------------------------------------------------------------------------
# Host-side layout prep: PyG-style batch (x, dense block-diag adj, batch vector)
# -> super-blocks of GB graphs (zero padded), adjacency in bf16, plus a per-block
# membership matrix memb[n, g] = 1 iff node n is a REAL node of local graph g.
# Nodes are assumed sorted by graph id (as PyG batches are; the reference
# aggregate() makes the same assumption).
# ---------------------------------------------------------------------------
def build_graph_blocks(x, adj, batch, num_graphs, target_rows=256):
    x = np.asarray(x, np.float32)
    adj = np.asarray(adj, np.float32)
    batch = np.asarray(batch).reshape(-1)
    counts = np.bincount(batch, minlength=num_graphs)
    npp = max(SUB, _rup(int(counts.max()), SUB))          # padded nodes per graph
    F = x.shape[1]
    fp8 = _rup(F, SUB)                                    # sublane-only feature padding
    # super-block GB graphs per grid step so the MXU M dimension is filled (review #1)
    GB = max(1, min(num_graphs, target_rows // npp))
    Gp = _rup(num_graphs, GB)
    NB = Gp // GB
    BN = GB * npp                                         # nodes per super-block

    xg = np.zeros((NB, BN, fp8), np.float32)
    ag = np.zeros((NB, BN, BN), np.float32)
    mg = np.zeros((NB, BN, GB), np.float32)
    st = 0
    for g in range(num_graphs):
        n = int(counts[g])
        b, lg = divmod(g, GB)
        r0 = lg * npp
        xg[b, r0:r0 + n, :F] = x[st:st + n]
        ag[b, r0:r0 + n, r0:r0 + n] = adj[st:st + n, st:st + n]   # diagonal block only
        mg[b, r0:r0 + n, lg] = 1.0
        st += n
    return dict(x=jnp.asarray(xg), adj=jnp.asarray(ag, dtype=jnp.bfloat16),
                memb=jnp.asarray(mg), n_nodes=int(batch.shape[0]),
                G=int(num_graphs), Gp=int(Gp), NB=int(NB), BN=int(BN),
                GB=int(GB), npp=int(npp), fp8=int(fp8))


# ---------------------------------------------------------------------------
# Parameter padding to lane-dense shapes.  Eval-mode BatchNorm is folded into a
# per-channel scale/shift.  Padded hidden channels keep exact zeros; padded
# softmax / log-softmax lanes get a -1e30 bias so they vanish.
# ---------------------------------------------------------------------------
def pad_params(params, num_features, hidden, num_classes):
    fp8 = _rup(num_features, SUB)
    hp = _rup(hidden, LANE)
    ap = LANE
    cpad = _rup(num_classes, LANE)

    def pad_lin(W, b, rows, cols, bias_fill=0.0):
        return (_pad2(W, rows, cols, 0.0), _pad2(b, 1, cols, bias_fill))

    def pad_conv(cparams, in_dim):
        W1, b1, W2, b2, ga, be, rm, rv = cparams
        W1p, b1p = pad_lin(W1, b1, in_dim, hp)
        W2p, b2p = pad_lin(W2, b2, hp, hp)
        # fold eval-mode BatchNorm into a single FMA (review #6)
        scale = jnp.asarray(ga, jnp.float32) * jax.lax.rsqrt(jnp.asarray(rv, jnp.float32) + _BN_EPS)
        shift = jnp.asarray(be, jnp.float32) - jnp.asarray(rm, jnp.float32) * scale
        return (W1p, b1p, W2p, b2p, _pad2(scale, 1, hp, 1.0), _pad2(shift, 1, hp, 0.0))

    convs = [pad_conv(params["conv1"], fp8)]
    for cpar in params["convs"]:
        convs.append(pad_conv(cpar, hp))

    c1 = pad_lin(*params["cluster1"], hp, hp)
    c2 = pad_lin(*params["cluster2"], hp, ap, bias_fill=_NEG)   # mask padded softmax lanes
    l1 = pad_lin(*params["lin1"], hp, hp)
    l2 = pad_lin(*params["lin2"], hp, cpad, bias_fill=_NEG)     # mask padded log-softmax lanes

    cb = _pad2(params["codebook"], params["codebook"].shape[0], hp)
    e2 = jnp.sum(cb * cb, axis=1)[None, :]                      # hoisted codebook norms (1, K)

    return dict(convs=convs, cluster1=c1, cluster2=c2, lin1=l1, lin2=l2,
                codebook=cb, e2=e2, fp8=fp8, hp=hp, ap=ap, cpad=cpad,
                h=hidden, c=num_classes)


# ---------------------------------------------------------------------------
# Kernel 1 (grid over graph super-blocks, "parallel"): fused GIN layer stack +
# assignment softmax + per-graph pos / node-sum / structural-penalty reductions.
# One lane-dense (GB, 3*hp) output slab per block: [pos | node-sum | penalty].
# Weights use a constant index_map so they stay resident in VMEM across the grid.
# ---------------------------------------------------------------------------
def gin_superblock_pallas(xg, adjg, membg, conv_params, cluster1, cluster2, *, hp):
    NB, BN, fp8 = xg.shape
    GB = membg.shape[2]
    L = len(conv_params)

    def kernel(*refs):
        adj_ref, x_ref, memb_ref = refs[0], refs[1], refs[2]
        conv_refs = refs[3:3 + 6 * L]
        c1w_ref, c1b_ref, c2w_ref, c2b_ref = refs[3 + 6 * L: 7 + 6 * L]
        out_ref = refs[7 + 6 * L]

        adj = adj_ref[...]                       # bf16 block-diagonal adjacency (no f32 copy)
        memb = memb_ref[...]                     # (BN, GB) membership * node-validity
        h = x_ref[...]                           # (BN, fp8) f32

        # ---- fused GIN layer stack (adjacency tile stays resident; bf16 MXU aggregation) ----
        for l in range(L):
            w1, b1, w2, b2, bsc, bsh = (r[...] for r in conv_refs[6 * l: 6 * l + 6])
            agg = h + jnp.dot(adj, h.astype(jnp.bfloat16),
                              preferred_element_type=jnp.float32)           # GIN, eps=0
            h = jnp.maximum(jnp.dot(agg, w1, preferred_element_type=jnp.float32) + b1, 0.0)
            h = jnp.maximum(jnp.dot(h, w2, preferred_element_type=jnp.float32) + b2, 0.0)
            h = h * bsc + bsh                                                # folded eval BN

        # ---- assignment = softmax(cluster2(tanh(cluster1(h)))) ; padded lanes hold -1e30 ----
        t = jnp.tanh(jnp.dot(h, c1w_ref[...], preferred_element_type=jnp.float32) + c1b_ref[...])
        logits = jnp.dot(t, c2w_ref[...], preferred_element_type=jnp.float32) + c2b_ref[...]
        mx = jnp.max(logits, axis=1, keepdims=True)
        e = jnp.exp(logits - mx)
        assign = e * pl.reciprocal(jnp.sum(e, axis=1, keepdims=True))        # exact recip (EUP)

        a0 = assign[:, 0:1]
        a1 = assign[:, 1:2]

        # ---- per-graph pos-embedding and node-sum: ONE memb^T @ [a0*h | h] matmul ----
        R = jnp.concatenate([a0 * h, h], axis=1)                             # (BN, 2*hp)
        red = jax.lax.dot_general(memb, R, (((0,), (0,)), ((), ())),
                                  preferred_element_type=jnp.float32)        # (GB, 2*hp)
        pos = red[:, :hp]
        xsum = red[:, hp:]

        # ---- per-graph 2x2 structural penalty (block-diagonal adj => t2 rows separate) ----
        t2 = jnp.dot(adj, assign.astype(jnp.bfloat16),
                     preferred_element_type=jnp.float32)                     # (BN, ap)
        t20 = t2[:, 0:1]
        t21 = t2[:, 1:2]
        cols = jnp.concatenate([a0 * t20, a0 * t21, a1 * t20, a1 * t21], axis=1)   # (BN, 4)
        new4 = jax.lax.dot_general(memb, cols, (((0,), (0,)), ((), ())),
                                   preferred_element_type=jnp.float32)       # (GB, 4)
        n00 = new4[:, 0:1]; n01 = new4[:, 1:2]; n10 = new4[:, 2:3]; n11 = new4[:, 3:4]
        d0 = n00 * pl.reciprocal(jnp.maximum(jnp.abs(n00) + jnp.abs(n01), _NORM_EPS))
        d1 = n11 * pl.reciprocal(jnp.maximum(jnp.abs(n10) + jnp.abs(n11), _NORM_EPS))
        pen = 0.5 * ((d0 - 1.0) ** 2 + (d1 - 1.0) ** 2)                      # (GB, 1)
        # (empty / padded graphs give exactly pen = 1.0; corrected in the head kernel)

        # ---- single lane-dense store per block: [pos | node-sum | penalty] ----
        out_ref[...] = jnp.concatenate(
            [pos, xsum, jnp.broadcast_to(pen, (GB, hp))], axis=1)

    flat_w = ([w for layer in conv_params for w in layer]
              + [cluster1[0], cluster1[1], cluster2[0], cluster2[1]])

    in_specs = [
        pl.BlockSpec((None, BN, BN), lambda b: (b, 0, 0)),    # bf16 adjacency super-block
        pl.BlockSpec((None, BN, fp8), lambda b: (b, 0, 0)),   # node features (sublane-padded)
        pl.BlockSpec((None, BN, GB), lambda b: (b, 0, 0)),    # membership / validity
    ] + [pl.BlockSpec(w.shape, lambda b: (0, 0)) for w in flat_w]   # weights stay resident

    out_spec = pl.BlockSpec((None, GB, 3 * hp), lambda b: (b, 0, 0))
    out_shape = jax.ShapeDtypeStruct((NB, GB, 3 * hp), jnp.float32)

    out = pl.pallas_call(
        kernel,
        grid=(NB,),
        in_specs=in_specs,
        out_specs=out_spec,
        out_shape=out_shape,
        compiler_params=pltpu.CompilerParams(
            dimension_semantics=("parallel",),
            vmem_limit_bytes=_VMEM_LIMIT),
    )(adjg, xg, membg, *flat_w)
    return out.reshape(NB * GB, 3 * hp)


# ---------------------------------------------------------------------------
# Kernel 2 (single small call): power-norm + VQ encode + noisy-channel transmit
# (row gather driven by host-supplied SMEM indices) + quantize + VQ loss +
# lin1 -> ReLU -> lin2 -> log_softmax, plus graph-embedding mean and penalty mean.
# ---------------------------------------------------------------------------
def vq_head_pallas(blockout, codebook_p, e2, lin1, lin2, src, *,
                   G, hp, h_real, c_real, n_nodes, n_pad_graphs, commitment_cost):
    Gp = blockout.shape[0]
    K = codebook_p.shape[0]
    cpad = lin2[0].shape[1]
    inv_gh = 1.0 / (G * h_real)      # padded hidden lanes are exact zeros
    inv_h = 1.0 / h_real
    inv_nodes = 1.0 / n_nodes
    inv_G = 1.0 / G
    cc = float(commitment_cost)

    def kernel(src_ref, blk_ref, cb_ref, e2_ref, w1_ref, b1_ref, w2_ref, b2_ref,
               logp_ref, q_ref, gr_ref, pen_ref, vq_ref, qraw_ref):
        blk = blk_ref[...]
        pos = blk[:, :hp]
        xsum = blk[:, hp:2 * hp]
        pen_col = blk[:, 2 * hp:2 * hp + 1]

        # ---- power normalization of the positive-substructure embedding ----
        p2 = jnp.sum(pos * pos) * inv_gh
        z = pos * jnp.where(jnp.sqrt(p2) > 1.0, jax.lax.rsqrt(p2), 1.0)

        # ---- graph embedding = mean over ALL real nodes (reference quirk), per graph ----
        gmean = jnp.sum(xsum, axis=0, keepdims=True) * inv_nodes           # (1, hp)
        g2 = jnp.sum(gmean * gmean) * inv_h
        gr_ref[...] = jnp.broadcast_to(
            gmean * jnp.where(jnp.sqrt(g2) > 1.0, jax.lax.rsqrt(g2), 1.0), (Gp, hp))

        # ---- mean structural penalty over real graphs (padded graphs contribute exactly 1) ----
        pen_ref[...] = jnp.full(
            (1, 1), (jnp.sum(pen_col) - float(n_pad_graphs)) * inv_G, jnp.float32)

        # ---- VQ-VAE encode: nearest frozen-codebook entry ----
        cb = cb_ref[...]
        d = (jnp.sum(z * z, axis=1, keepdims=True) + e2_ref[...]
             - 2.0 * jax.lax.dot_general(z, cb, (((1,), (1,)), ((), ())),
                                         preferred_element_type=jnp.float32))    # (Gp, K)
        col = jax.lax.broadcasted_iota(jnp.int32, (Gp, K), 1)
        dmin = jnp.min(d, axis=1, keepdims=True)
        idx = jnp.min(jnp.where(d == dmin, col, K), axis=1, keepdims=True)        # first argmin
        enc = (col == idx).astype(jnp.float32)                                    # one-hot
        qraw_ref[...] = jnp.dot(enc, cb, preferred_element_type=jnp.float32)      # (Gp, hp)

        # ---- noisy-channel transmission: per-row gather with host-computed indices ----
        # TODO(synk): grid this head over graph tiles if G grows beyond a few thousand.
        for i in range(Gp):
            s = src_ref[i]
            q_ref[pl.ds(i, 1), :] = qraw_ref[pl.ds(s, 1), :]
        qt = q_ref[...]

        # ---- VQ loss (straight-through forward value); only real rows contribute ----
        valid = (jax.lax.broadcasted_iota(jnp.int32, (Gp, 1), 0) < G).astype(jnp.float32)
        diff = (qt - z) * valid
        vq_ref[...] = jnp.full((1, 1), (1.0 + cc) * jnp.sum(diff * diff) * inv_gh, jnp.float32)

        # ---- classifier: lin1 -> ReLU -> (dropout=id, eval) -> lin2 -> log_softmax ----
        h1 = jnp.maximum(jnp.dot(qt, w1_ref[...], preferred_element_type=jnp.float32)
                         + b1_ref[...], 0.0)
        logits = jnp.dot(h1, w2_ref[...], preferred_element_type=jnp.float32) + b2_ref[...]
        m = jnp.max(logits, axis=1, keepdims=True)
        lse = m + jnp.log(jnp.sum(jnp.exp(logits - m), axis=1, keepdims=True))
        logp_ref[...] = logits - lse

    vmem = pl.BlockSpec(memory_space=pltpu.MemorySpace.VMEM)
    smem = pl.BlockSpec(memory_space=pltpu.MemorySpace.SMEM)
    logp, q, gr, pen, vq, _ = pl.pallas_call(
        kernel,
        in_specs=[smem] + [vmem] * 7,
        out_specs=(vmem, vmem, vmem, vmem, vmem, vmem),
        out_shape=(
            jax.ShapeDtypeStruct((Gp, cpad), jnp.float32),
            jax.ShapeDtypeStruct((Gp, hp), jnp.float32),
            jax.ShapeDtypeStruct((Gp, hp), jnp.float32),
            jax.ShapeDtypeStruct((1, 1), jnp.float32),
            jax.ShapeDtypeStruct((1, 1), jnp.float32),
            jax.ShapeDtypeStruct((Gp, hp), jnp.float32),   # pre-channel quantized (scratch buffer)
        ),
    )(src, blockout, codebook_p, e2, lin1[0], lin1[1], lin2[0], lin2[1])
    # strip lane / graph padding added for MXU & store efficiency
    return logp[:G, :c_real], q[:G, :h_real], gr[:G, :h_real], pen, vq


# ---------------------------------------------------------------------------
# Full GIBGIN forward (eval mode).
# ---------------------------------------------------------------------------
def gibgin_forward(padded, blocks, u, correct_p, commitment_cost):
    blockout = gin_superblock_pallas(
        blocks["x"], blocks["adj"], blocks["memb"],
        padded["convs"], padded["cluster1"], padded["cluster2"], hp=padded["hp"])

    G, Gp = blocks["G"], blocks["Gp"]
    # noisy channel source indices (reference uses host random.random() per row).
    # TODO(synk): jax.random uniforms are distributionally equivalent, not bit-identical,
    # to Python random.random() used in the reference.
    K = padded["codebook"].shape[0]
    cp = float(correct_p)
    step = max((1.0 - cp) / K, 1e-12)
    i = jnp.arange(G, dtype=jnp.int32)
    shift = jnp.floor((u - cp) / step).astype(jnp.int32)
    src = jnp.where(u <= cp, i, jnp.remainder(i + 1 + shift, G)).astype(jnp.int32)
    src = jnp.concatenate([src, jnp.arange(G, Gp, dtype=jnp.int32)])   # identity for padded rows

    return vq_head_pallas(
        blockout, padded["codebook"], padded["e2"], padded["lin1"], padded["lin2"], src,
        G=G, hp=padded["hp"], h_real=padded["h"], c_real=padded["c"],
        n_nodes=blocks["n_nodes"], n_pad_graphs=Gp - G, commitment_cost=commitment_cost)


if __name__ == "__main__":
    key = jax.random.PRNGKey(0)
    num_features, hidden, num_classes = 4, 32, 3
    num_layers = 2
    nodes_per_graph, num_graphs = 4, 4
    N = nodes_per_graph * num_graphs
    K = 128  # num_embeddings

    keys = jax.random.split(key, 16)

    def lin(k, din, dout, scale=0.3):
        kw, kb = jax.random.split(k)
        return (scale * jax.random.normal(kw, (din, dout), jnp.float32),
                scale * jax.random.normal(kb, (1, dout), jnp.float32))

    def gin_params(k, din, h):
        k1, k2 = jax.random.split(k)
        W1, b1 = lin(k1, din, h)
        W2, b2 = lin(k2, h, h)
        return (W1, b1, W2, b2,
                jnp.ones((1, h), jnp.float32), jnp.zeros((1, h), jnp.float32),
                jnp.zeros((1, h), jnp.float32), jnp.ones((1, h), jnp.float32))

    params = {
        "conv1": gin_params(keys[0], num_features, hidden),
        "convs": [gin_params(keys[1 + i], hidden, hidden) for i in range(num_layers - 1)],
        "cluster1": lin(keys[5], hidden, hidden),
        "cluster2": lin(keys[6], hidden, 2),
        "lin1": lin(keys[7], hidden, hidden),
        "lin2": lin(keys[8], hidden, num_classes),
        "codebook": jax.random.normal(keys[9], (K, hidden), jnp.float32),
    }

    # node features
    x = jax.random.normal(keys[10], (N, num_features), jnp.float32)

    # block-diagonal symmetric adjacency (ring within each graph) == to_dense_adj(edge_index)[0]
    A = np.zeros((N, N), np.float32)
    for g in range(num_graphs):
        base = g * nodes_per_graph
        for t in range(nodes_per_graph):
            i, j = base + t, base + (t + 1) % nodes_per_graph
            A[i, j] = 1.0
            A[j, i] = 1.0
    batch = np.repeat(np.arange(num_graphs, dtype=np.int32), nodes_per_graph)

    padded = pad_params(params, num_features, hidden, num_classes)
    blocks = build_graph_blocks(np.asarray(x), A, batch, num_graphs)

    # per-graph channel uniforms (reference: host random.random() per row)
    u = jax.random.uniform(keys[11], (num_graphs,), dtype=jnp.float32)

    outs = gibgin_forward(padded, blocks, u, correct_p=0.9, commitment_cost=0.25)
    jax.block_until_ready(outs)

    logp, pos_emb, graph_emb, pen, vq_loss = outs
    assert logp.shape == (num_graphs, num_classes)
    assert pos_emb.shape == (num_graphs, hidden)
    assert graph_emb.shape == (num_graphs, hidden)
    assert pen.shape == (1, 1) and vq_loss.shape == (1, 1)
    assert bool(jnp.all(jnp.isfinite(logp)))
    assert bool(jnp.all(jnp.isfinite(pos_emb))) and bool(jnp.all(jnp.isfinite(graph_emb)))
    print("KERNEL_OK")
</pallas_src>

<mosaic_0001>
module attributes {stable_mosaic.version = 11 : i64} {
  func.func @kernel(%arg0: i32, %arg1: memref<1x32x32xbf16, #tpu.memory_space<vmem>>, %arg2: memref<1x32x8xf32, #tpu.memory_space<vmem>>, %arg3: memref<1x32x4xf32, #tpu.memory_space<vmem>>, %arg4: memref<8x128xf32, #tpu.memory_space<vmem>>, %arg5: memref<1x128xf32, #tpu.memory_space<vmem>>, %arg6: memref<128x128xf32, #tpu.memory_space<vmem>>, %arg7: memref<1x128xf32, #tpu.memory_space<vmem>>, %arg8: memref<1x128xf32, #tpu.memory_space<vmem>>, %arg9: memref<1x128xf32, #tpu.memory_space<vmem>>, %arg10: memref<128x128xf32, #tpu.memory_space<vmem>>, %arg11: memref<1x128xf32, #tpu.memory_space<vmem>>, %arg12: memref<128x128xf32, #tpu.memory_space<vmem>>, %arg13: memref<1x128xf32, #tpu.memory_space<vmem>>, %arg14: memref<1x128xf32, #tpu.memory_space<vmem>>, %arg15: memref<1x128xf32, #tpu.memory_space<vmem>>, %arg16: memref<128x128xf32, #tpu.memory_space<vmem>>, %arg17: memref<1x128xf32, #tpu.memory_space<vmem>>, %arg18: memref<128x128xf32, #tpu.memory_space<vmem>>, %arg19: memref<1x128xf32, #tpu.memory_space<vmem>>, %arg20: memref<1x4x384xf32, #tpu.memory_space<vmem>>) attributes {dimension_semantics = [#tpu.dimension_semantics<parallel>], iteration_bounds = array<i64: 1>, scalar_prefetch = 0 : i64, scratch_operands = 0 : i64, tpu.core_type = #tpu.core_type<tc>, window_params = [{transform_indices = @transform_0, window_bounds = array<i64: 1, 32, 32>}, {transform_indices = @transform_1, window_bounds = array<i64: 1, 32, 8>}, {transform_indices = @transform_2, window_bounds = array<i64: 1, 32, 4>}, {pipeline_mode = #tpu.pipeline_mode<synchronous>, transform_indices = @transform_3, window_bounds = array<i64: 8, 128>}, {pipeline_mode = #tpu.pipeline_mode<synchronous>, transform_indices = @transform_4, window_bounds = array<i64: 1, 128>}, {pipeline_mode = #tpu.pipeline_mode<synchronous>, transform_indices = @transform_5, window_bounds = array<i64: 128, 128>}, {pipeline_mode = #tpu.pipeline_mode<synchronous>, transform_indices = @transform_6, window_bounds = array<i64: 1, 128>}, {pipeline_mode = #tpu.pipeline_mode<synchronous>, transform_indices = @transform_7, window_bounds = array<i64: 1, 128>}, {pipeline_mode = #tpu.pipeline_mode<synchronous>, transform_indices = @transform_8, window_bounds = array<i64: 1, 128>}, {pipeline_mode = #tpu.pipeline_mode<synchronous>, transform_indices = @transform_9, window_bounds = array<i64: 128, 128>}, {pipeline_mode = #tpu.pipeline_mode<synchronous>, transform_indices = @transform_10, window_bounds = array<i64: 1, 128>}, {pipeline_mode = #tpu.pipeline_mode<synchronous>, transform_indices = @transform_11, window_bounds = array<i64: 128, 128>}, {pipeline_mode = #tpu.pipeline_mode<synchronous>, transform_indices = @transform_12, window_bounds = array<i64: 1, 128>}, {pipeline_mode = #tpu.pipeline_mode<synchronous>, transform_indices = @transform_13, window_bounds = array<i64: 1, 128>}, {pipeline_mode = #tpu.pipeline_mode<synchronous>, transform_indices = @transform_14, window_bounds = array<i64: 1, 128>}, {pipeline_mode = #tpu.pipeline_mode<synchronous>, transform_indices = @transform_15, window_bounds = array<i64: 128, 128>}, {pipeline_mode = #tpu.pipeline_mode<synchronous>, transform_indices = @transform_16, window_bounds = array<i64: 1, 128>}, {pipeline_mode = #tpu.pipeline_mode<synchronous>, transform_indices = @transform_17, window_bounds = array<i64: 128, 128>}, {pipeline_mode = #tpu.pipeline_mode<synchronous>, transform_indices = @transform_18, window_bounds = array<i64: 1, 128>}, {transform_indices = @transform_19, window_bounds = array<i64: 1, 4, 384>}]} {
    %c0 = arith.constant 0 : index
    %c0_0 = arith.constant 0 : index
    %c0_1 = arith.constant 0 : index
    %0 = vector.load %arg1[%c0, %c0_0, %c0_1] : memref<1x32x32xbf16, #tpu.memory_space<vmem>>, vector<1x32x32xbf16>
    %1 = vector.shape_cast %0 : vector<1x32x32xbf16> to vector<32x32xbf16>
    %c0_2 = arith.constant 0 : index
    %c0_3 = arith.constant 0 : index
    %c0_4 = arith.constant 0 : index
    %2 = vector.load %arg3[%c0_2, %c0_3, %c0_4] : memref<1x32x4xf32, #tpu.memory_space<vmem>>, vector<1x32x4xf32>
    %3 = vector.shape_cast %2 : vector<1x32x4xf32> to vector<32x4xf32>
    %c0_5 = arith.constant 0 : index
    %c0_6 = arith.constant 0 : index
    %c0_7 = arith.constant 0 : index
    %4 = vector.load %arg2[%c0_5, %c0_6, %c0_7] : memref<1x32x8xf32, #tpu.memory_space<vmem>>, vector<1x32x8xf32>
    %5 = vector.shape_cast %4 : vector<1x32x8xf32> to vector<32x8xf32>
    %c0_8 = arith.constant 0 : index
    %c0_9 = arith.constant 0 : index
    %6 = vector.load %arg4[%c0_8, %c0_9] : memref<8x128xf32, #tpu.memory_space<vmem>>, vector<8x128xf32>
    %c0_10 = arith.constant 0 : index
    %c0_11 = arith.constant 0 : index
    %7 = vector.load %arg5[%c0_10, %c0_11] : memref<1x128xf32, #tpu.memory_space<vmem>>, vector<1x128xf32>
    %c0_12 = arith.constant 0 : index
    %c0_13 = arith.constant 0 : index
    %8 = vector.load %arg6[%c0_12, %c0_13] : memref<128x128xf32, #tpu.memory_space<vmem>>, vector<128x128xf32>
    %c0_14 = arith.constant 0 : index
    %c0_15 = arith.constant 0 : index
    %9 = vector.load %arg7[%c0_14, %c0_15] : memref<1x128xf32, #tpu.memory_space<vmem>>, vector<1x128xf32>
    %c0_16 = arith.constant 0 : index
    %c0_17 = arith.constant 0 : index
    %10 = vector.load %arg8[%c0_16, %c0_17] : memref<1x128xf32, #tpu.memory_space<vmem>>, vector<1x128xf32>
    %c0_18 = arith.constant 0 : index
    %c0_19 = arith.constant 0 : index
    %11 = vector.load %arg9[%c0_18, %c0_19] : memref<1x128xf32, #tpu.memory_space<vmem>>, vector<1x128xf32>
    %12 = arith.truncf %5 : vector<32x8xf32> to vector<32x8xbf16>
    %cst = arith.constant dense<0.000000e+00> : vector<32x8xf32>
    %13 = tpu.matmul %1, %12, %cst {dimension_numbers = #tpu.dot_dimension_numbers<[1], [0], [0], [1], [0, 0, 1, 1], [], []>} : vector<32x32xbf16>, vector<32x8xbf16>, vector<32x8xf32> -> vector<32x8xf32>
    %14 = arith.addf %5, %13 : vector<32x8xf32>
    %cst_20 = arith.constant dense<0.000000e+00> : vector<32x128xf32>
    %15 = tpu.matmul %14, %6, %cst_20 {dimension_numbers = #tpu.dot_dimension_numbers<[1], [0], [0], [1], [0, 0, 1, 1], [], []>} : vector<32x8xf32>, vector<8x128xf32>, vector<32x128xf32> -> vector<32x128xf32>
    %16 = vector.broadcast %7 : vector<1x128xf32> to vector<32x128xf32>
    %17 = arith.addf %15, %16 : vector<32x128xf32>
    %cst_21 = arith.constant 0.000000e+00 : f32
    %18 = vector.broadcast %cst_21 : f32 to vector<32x128xf32>
    %19 = arith.maximumf %17, %18 : vector<32x128xf32>
    %cst_22 = arith.constant dense<0.000000e+00> : vector<32x128xf32>
    %20 = tpu.matmul %19, %8, %cst_22 {dimension_numbers = #tpu.dot_dimension_numbers<[1], [0], [0], [1], [0, 0, 1, 1], [], []>} : vector<32x128xf32>, vector<128x128xf32>, vector<32x128xf32> -> vector<32x128xf32>
    %21 = vector.broadcast %9 : vector<1x128xf32> to vector<32x128xf32>
    %22 = arith.addf %20, %21 : vector<32x128xf32>
    %cst_23 = arith.constant 0.000000e+00 : f32
    %23 = vector.broadcast %cst_23 : f32 to vector<32x128xf32>
    %24 = arith.maximumf %22, %23 : vector<32x128xf32>
    %25 = vector.broadcast %10 : vector<1x128xf32> to vector<32x128xf32>
    %26 = arith.mulf %24, %25 : vector<32x128xf32>
    %27 = vector.broadcast %11 : vector<1x128xf32> to vector<32x128xf32>
    %28 = arith.addf %26, %27 : vector<32x128xf32>
    %c0_24 = arith.constant 0 : index
    %c0_25 = arith.constant 0 : index
    %29 = vector.load %arg10[%c0_24, %c0_25] : memref<128x128xf32, #tpu.memory_space<vmem>>, vector<128x128xf32>
    %c0_26 = arith.constant 0 : index
    %c0_27 = arith.constant 0 : index
    %30 = vector.load %arg11[%c0_26, %c0_27] : memref<1x128xf32, #tpu.memory_space<vmem>>, vector<1x128xf32>
    %c0_28 = arith.constant 0 : index
    %c0_29 = arith.constant 0 : index
    %31 = vector.load %arg12[%c0_28, %c0_29] : memref<128x128xf32, #tpu.memory_space<vmem>>, vector<128x128xf32>
    %c0_30 = arith.constant 0 : index
    %c0_31 = arith.constant 0 : index
    %32 = vector.load %arg13[%c0_30, %c0_31] : memref<1x128xf32, #tpu.memory_space<vmem>>, vector<1x128xf32>
    %c0_32 = arith.constant 0 : index
    %c0_33 = arith.constant 0 : index
    %33 = vector.load %arg14[%c0_32, %c0_33] : memref<1x128xf32, #tpu.memory_space<vmem>>, vector<1x128xf32>
    %c0_34 = arith.constant 0 : index
    %c0_35 = arith.constant 0 : index
    %34 = vector.load %arg15[%c0_34, %c0_35] : memref<1x128xf32, #tpu.memory_space<vmem>>, vector<1x128xf32>
    %35 = arith.truncf %28 : vector<32x128xf32> to vector<32x128xbf16>
    %cst_36 = arith.constant dense<0.000000e+00> : vector<32x128xf32>
    %36 = tpu.matmul %1, %35, %cst_36 {dimension_numbers = #tpu.dot_dimension_numbers<[1], [0], [0], [1], [0, 0, 1, 1], [], []>} : vector<32x32xbf16>, vector<32x128xbf16>, vector<32x128xf32> -> vector<32x128xf32>
    %37 = arith.addf %28, %36 : vector<32x128xf32>
    %cst_37 = arith.constant dense<0.000000e+00> : vector<32x128xf32>
    %38 = tpu.matmul %37, %29, %cst_37 {dimension_numbers = #tpu.dot_dimension_numbers<[1], [0], [0], [1], [0, 0, 1, 1], [], []>} : vector<32x128xf32>, vector<128x128xf32>, vector<32x128xf32> -> vector<32x128xf32>
    %39 = vector.broadcast %30 : vector<1x128xf32> to vector<32x128xf32>
    %40 = arith.addf %38, %39 : vector<32x128xf32>
    %cst_38 = arith.constant 0.000000e+00 : f32
    %41 = vector.broadcast %cst_38 : f32 to vector<32x128xf32>
    %42 = arith.maximumf %40, %41 : vector<32x128xf32>
    %cst_39 = arith.constant dense<0.000000e+00> : vector<32x128xf32>
    %43 = tpu.matmul %42, %31, %cst_39 {dimension_numbers = #tpu.dot_dimension_numbers<[1], [0], [0], [1], [0, 0, 1, 1], [], []>} : vector<32x128xf32>, vector<128x128xf32>, vector<32x128xf32> -> vector<32x128xf32>
    %44 = vector.broadcast %32 : vector<1x128xf32> to vector<32x128xf32>
    %45 = arith.addf %43, %44 : vector<32x128xf32>
    %cst_40 = arith.constant 0.000000e+00 : f32
    %46 = vector.broadcast %cst_40 : f32 to vector<32x128xf32>
    %47 = arith.maximumf %45, %46 : vector<32x128xf32>
    %48 = vector.broadcast %33 : vector<1x128xf32> to vector<32x128xf32>
    %49 = arith.mulf %47, %48 : vector<32x128xf32>
    %50 = vector.broadcast %34 : vector<1x128xf32> to vector<32x128xf32>
    %51 = arith.addf %49, %50 : vector<32x128xf32>
    %c0_41 = arith.constant 0 : index
    %c0_42 = arith.constant 0 : index
    %52 = vector.load %arg16[%c0_41, %c0_42] : memref<128x128xf32, #tpu.memory_space<vmem>>, vector<128x128xf32>
    %cst_43 = arith.constant dense<0.000000e+00> : vector<32x128xf32>
    %53 = tpu.matmul %51, %52, %cst_43 {dimension_numbers = #tpu.dot_dimension_numbers<[1], [0], [0], [1], [0, 0, 1, 1], [], []>} : vector<32x128xf32>, vector<128x128xf32>, vector<32x128xf32> -> vector<32x128xf32>
    %c0_44 = arith.constant 0 : index
    %c0_45 = arith.constant 0 : index
    %54 = vector.load %arg17[%c0_44, %c0_45] : memref<1x128xf32, #tpu.memory_space<vmem>>, vector<1x128xf32>
    %55 = vector.broadcast %54 : vector<1x128xf32> to vector<32x128xf32>
    %56 = arith.addf %53, %55 : vector<32x128xf32>
    %57 = math.tanh %56 : vector<32x128xf32>
    %c0_46 = arith.constant 0 : index
    %c0_47 = arith.constant 0 : index
    %58 = vector.load %arg18[%c0_46, %c0_47] : memref<128x128xf32, #tpu.memory_space<vmem>>, vector<128x128xf32>
    %cst_48 = arith.constant dense<0.000000e+00> : vector<32x128xf32>
    %59 = tpu.matmul %57, %58, %cst_48 {dimension_numbers = #tpu.dot_dimension_numbers<[1], [0], [0], [1], [0, 0, 1, 1], [], []>} : vector<32x128xf32>, vector<128x128xf32>, vector<32x128xf32> -> vector<32x128xf32>
    %c0_49 = arith.constant 0 : index
    %c0_50 = arith.constant 0 : index
    %60 = vector.load %arg19[%c0_49, %c0_50] : memref<1x128xf32, #tpu.memory_space<vmem>>, vector<1x128xf32>
    %61 = vector.broadcast %60 : vector<1x128xf32> to vector<32x128xf32>
    %62 = arith.addf %59, %61 : vector<32x128xf32>
    %cst_51 = arith.constant dense<0xFF800000> : vector<32xf32>
    %63 = vector.multi_reduction <maximumf>, %62, %cst_51 [1] : vector<32x128xf32> to vector<32xf32>
    %64 = vector.shape_cast %63 : vector<32xf32> to vector<32x1xf32>
    %65 = vector.broadcast %64 : vector<32x1xf32> to vector<32x128xf32>
    %66 = arith.subf %62, %65 : vector<32x128xf32>
    %67 = math.exp %66 : vector<32x128xf32>
    %cst_52 = arith.constant dense<0.000000e+00> : vector<32xf32>
    %68 = vector.multi_reduction <add>, %67, %cst_52 [1] : vector<32x128xf32> to vector<32xf32>
    %69 = vector.shape_cast %68 : vector<32xf32> to vector<32x1xf32>
    %70 = tpu.reciprocal %69 : vector<32x1xf32> -> vector<32x1xf32>
    %71 = vector.broadcast %70 : vector<32x1xf32> to vector<32x128xf32>
    %72 = arith.mulf %67, %71 : vector<32x128xf32>
    %73 = vector.extract_strided_slice %72 {offsets = [0, 0], sizes = [32, 1], strides = [1, 1]} : vector<32x128xf32> to vector<32x1xf32>
    %74 = vector.extract_strided_slice %72 {offsets = [0, 1], sizes = [32, 1], strides = [1, 1]} : vector<32x128xf32> to vector<32x1xf32>
    %75 = vector.broadcast %73 : vector<32x1xf32> to vector<32x128xf32>
    %76 = arith.mulf %75, %51 : vector<32x128xf32>
    %77 = tpu.concatenate %76, %51 in 1 : vector<32x128xf32>, vector<32x128xf32> -> vector<32x256xf32>
    %cst_53 = arith.constant dense<0.000000e+00> : vector<4x256xf32>
    %78 = tpu.matmul %3, %77, %cst_53 {dimension_numbers = #tpu.dot_dimension_numbers<[0], [0], [1], [1], [0, 1, 1, 1], [], []>} : vector<32x4xf32>, vector<32x256xf32>, vector<4x256xf32> -> vector<4x256xf32>
    %79 = vector.extract_strided_slice %78 {offsets = [0, 0], sizes = [4, 128], strides = [1, 1]} : vector<4x256xf32> to vector<4x128xf32>
    %80 = vector.extract_strided_slice %78 {offsets = [0, 128], sizes = [4, 128], strides = [1, 1]} : vector<4x256xf32> to vector<4x128xf32>
    %81 = arith.truncf %72 : vector<32x128xf32> to vector<32x128xbf16>
    %cst_54 = arith.constant dense<0.000000e+00> : vector<32x128xf32>
    %82 = tpu.matmul %1, %81, %cst_54 {dimension_numbers = #tpu.dot_dimension_numbers<[1], [0], [0], [1], [0, 0, 1, 1], [], []>} : vector<32x32xbf16>, vector<32x128xbf16>, vector<32x128xf32> -> vector<32x128xf32>
    %83 = vector.extract_strided_slice %82 {offsets = [0, 0], sizes = [32, 1], strides = [1, 1]} : vector<32x128xf32> to vector<32x1xf32>
    %84 = vector.extract_strided_slice %82 {offsets = [0, 1], sizes = [32, 1], strides = [1, 1]} : vector<32x128xf32> to vector<32x1xf32>
    %85 = arith.mulf %73, %83 : vector<32x1xf32>
    %86 = arith.mulf %73, %84 : vector<32x1xf32>
    %87 = arith.mulf %74, %83 : vector<32x1xf32>
    %88 = arith.mulf %74, %84 : vector<32x1xf32>
    %89 = tpu.concatenate %85, %86, %87, %88 in 1 : vector<32x1xf32>, vector<32x1xf32>, vector<32x1xf32>, vector<32x1xf32> -> vector<32x4xf32>
    %cst_55 = arith.constant dense<0.000000e+00> : vector<4x4xf32>
    %90 = tpu.matmul %3, %89, %cst_55 {dimension_numbers = #tpu.dot_dimension_numbers<[0], [0], [1], [1], [0, 1, 1, 1], [], []>} : vector<32x4xf32>, vector<32x4xf32>, vector<4x4xf32> -> vector<4x4xf32>
    %91 = vector.extract_strided_slice %90 {offsets = [0, 0], sizes = [4, 1], strides = [1, 1]} : vector<4x4xf32> to vector<4x1xf32>
    %92 = vector.extract_strided_slice %90 {offsets = [0, 1], sizes = [4, 1], strides = [1, 1]} : vector<4x4xf32> to vector<4x1xf32>
    %93 = vector.extract_strided_slice %90 {offsets = [0, 2], sizes = [4, 1], strides = [1, 1]} : vector<4x4xf32> to vector<4x1xf32>
    %94 = vector.extract_strided_slice %90 {offsets = [0, 3], sizes = [4, 1], strides = [1, 1]} : vector<4x4xf32> to vector<4x1xf32>
    %95 = math.absf %91 : vector<4x1xf32>
    %96 = math.absf %92 : vector<4x1xf32>
    %97 = arith.addf %95, %96 : vector<4x1xf32>
    %cst_56 = arith.constant 9.99999996E-13 : f32
    %98 = vector.broadcast %cst_56 : f32 to vector<4x1xf32>
    %99 = arith.maximumf %97, %98 : vector<4x1xf32>
    %100 = tpu.reciprocal %99 : vector<4x1xf32> -> vector<4x1xf32>
    %101 = arith.mulf %91, %100 : vector<4x1xf32>
    %102 = math.absf %93 : vector<4x1xf32>
    %103 = math.absf %94 : vector<4x1xf32>
    %104 = arith.addf %102, %103 : vector<4x1xf32>
    %cst_57 = arith.constant 9.99999996E-13 : f32
    %105 = vector.broadcast %cst_57 : f32 to vector<4x1xf32>
    %106 = arith.maximumf %104, %105 : vector<4x1xf32>
    %107 = tpu.reciprocal %106 : vector<4x1xf32> -> vector<4x1xf32>
    %108 = arith.mulf %94, %107 : vector<4x1xf32>
    %cst_58 = arith.constant 1.000000e+00 : f32
    %109 = vector.broadcast %cst_58 : f32 to vector<4x1xf32>
    %110 = arith.subf %101, %109 : vector<4x1xf32>
    %111 = arith.mulf %110, %110 : vector<4x1xf32>
    %cst_59 = arith.constant 1.000000e+00 : f32
    %112 = vector.broadcast %cst_59 : f32 to vector<4x1xf32>
    %113 = arith.subf %108, %112 : vector<4x1xf32>
    %114 = arith.mulf %113, %113 : vector<4x1xf32>
    %115 = arith.addf %111, %114 : vector<4x1xf32>
    %cst_60 = arith.constant 5.000000e-01 : f32
    %116 = vector.broadcast %cst_60 : f32 to vector<4x1xf32>
    %117 = arith.mulf %116, %115 : vector<4x1xf32>
    %118 = vector.shape_cast %117 : vector<4x1xf32> to vector<4x1xf32>
    %119 = vector.broadcast %118 : vector<4x1xf32> to vector<4x128xf32>
    %120 = tpu.concatenate %79, %80, %119 in 1 : vector<4x128xf32>, vector<4x128xf32>, vector<4x128xf32> -> vector<4x384xf32>
    %c0_61 = arith.constant 0 : index
    %c0_62 = arith.constant 0 : index
    %c0_63 = arith.constant 0 : index
    %121 = vector.load %arg20[%c0_61, %c0_62, %c0_63] : memref<1x4x384xf32, #tpu.memory_space<vmem>>, vector<1x4x384xf32>
    %122 = vector.shape_cast %121 : vector<1x4x384xf32> to vector<4x384xf32>
    %123 = vector.shape_cast %120 : vector<4x384xf32> to vector<1x4x384xf32>
    tpu.vector_store %arg20[%c0_61, %c0_62, %c0_63], %123 {strides = array<i32>} : memref<1x4x384xf32, #tpu.memory_space<vmem>>, vector<1x4x384xf32>,
    return
  }
  func.func @transform_0(%arg0: i32) -> (i32, i32, i32) {
    %c0_i32 = arith.constant 0 : i32
    %c0_i32_0 = arith.constant 0 : i32
    %c0_i32_1 = arith.constant 0 : i32
    return %arg0, %c0_i32, %c0_i32_0 : i32, i32, i32
  }
  func.func @transform_1(%arg0: i32) -> (i32, i32, i32) {
    %c0_i32 = arith.constant 0 : i32
    %c0_i32_0 = arith.constant 0 : i32
    %c0_i32_1 = arith.constant 0 : i32
    return %arg0, %c0_i32, %c0_i32_0 : i32, i32, i32
  }
  func.func @transform_2(%arg0: i32) -> (i32, i32, i32) {
    %c0_i32 = arith.constant 0 : i32
    %c0_i32_0 = arith.constant 0 : i32
    %c0_i32_1 = arith.constant 0 : i32
    return %arg0, %c0_i32, %c0_i32_0 : i32, i32, i32
  }
  func.func @transform_3(%arg0: i32) -> (i32, i32) {
    %c0_i32 = arith.constant 0 : i32
    %c0_i32_0 = arith.constant 0 : i32
    %c0_i32_1 = arith.constant 0 : i32
    return %c0_i32, %c0_i32_0 : i32, i32
  }
  func.func @transform_4(%arg0: i32) -> (i32, i32) {
    %c0_i32 = arith.constant 0 : i32
    %c0_i32_0 = arith.constant 0 : i32
    %c0_i32_1 = arith.constant 0 : i32
    return %c0_i32, %c0_i32_0 : i32, i32
  }
  func.func @transform_5(%arg0: i32) -> (i32, i32) {
    %c0_i32 = arith.constant 0 : i32
    %c0_i32_0 = arith.constant 0 : i32
    %c0_i32_1 = arith.constant 0 : i32
    return %c0_i32, %c0_i32_0 : i32, i32
  }
  func.func @transform_6(%arg0: i32) -> (i32, i32) {
    %c0_i32 = arith.constant 0 : i32
    %c0_i32_0 = arith.constant 0 : i32
    %c0_i32_1 = arith.constant 0 : i32
    return %c0_i32, %c0_i32_0 : i32, i32
  }
  func.func @transform_7(%arg0: i32) -> (i32, i32) {
    %c0_i32 = arith.constant 0 : i32
    %c0_i32_0 = arith.constant 0 : i32
    %c0_i32_1 = arith.constant 0 : i32
    return %c0_i32, %c0_i32_0 : i32, i32
  }
  func.func @transform_8(%arg0: i32) -> (i32, i32) {
    %c0_i32 = arith.constant 0 : i32
    %c0_i32_0 = arith.constant 0 : i32
    %c0_i32_1 = arith.constant 0 : i32
    return %c0_i32, %c0_i32_0 : i32, i32
  }
  func.func @transform_9(%arg0: i32) -> (i32, i32) {
    %c0_i32 = arith.constant 0 : i32
    %c0_i32_0 = arith.constant 0 : i32
    %c0_i32_1 = arith.constant 0 : i32
    return %c0_i32, %c0_i32_0 : i32, i32
  }
  func.func @transform_10(%arg0: i32) -> (i32, i32) {
    %c0_i32 = arith.constant 0 : i32
    %c0_i32_0 = arith.constant 0 : i32
    %c0_i32_1 = arith.constant 0 : i32
    return %c0_i32, %c0_i32_0 : i32, i32
  }
  func.func @transform_11(%arg0: i32) -> (i32, i32) {
    %c0_i32 = arith.constant 0 : i32
    %c0_i32_0 = arith.constant 0 : i32
    %c0_i32_1 = arith.constant 0 : i32
    return %c0_i32, %c0_i32_0 : i32, i32
  }
  func.func @transform_12(%arg0: i32) -> (i32, i32) {
    %c0_i32 = arith.constant 0 : i32
    %c0_i32_0 = arith.constant 0 : i32
    %c0_i32_1 = arith.constant 0 : i32
    return %c0_i32, %c0_i32_0 : i32, i32
  }
  func.func @transform_13(%arg0: i32) -> (i32, i32) {
    %c0_i32 = arith.constant 0 : i32
    %c0_i32_0 = arith.constant 0 : i32
    %c0_i32_1 = arith.constant 0 : i32
    return %c0_i32, %c0_i32_0 : i32, i32
  }
  func.func @transform_14(%arg0: i32) -> (i32, i32) {
    %c0_i32 = arith.constant 0 : i32
    %c0_i32_0 = arith.constant 0 : i32
    %c0_i32_1 = arith.constant 0 : i32
    return %c0_i32, %c0_i32_0 : i32, i32
  }
  func.func @transform_15(%arg0: i32) -> (i32, i32) {
    %c0_i32 = arith.constant 0 : i32
    %c0_i32_0 = arith.constant 0 : i32
    %c0_i32_1 = arith.constant 0 : i32
    return %c0_i32, %c0_i32_0 : i32, i32
  }
  func.func @transform_16(%arg0: i32) -> (i32, i32) {
    %c0_i32 = arith.constant 0 : i32
    %c0_i32_0 = arith.constant 0 : i32
    %c0_i32_1 = arith.constant 0 : i32
    return %c0_i32, %c0_i32_0 : i32, i32
  }
  func.func @transform_17(%arg0: i32) -> (i32, i32) {
    %c0_i32 = arith.constant 0 : i32
    %c0_i32_0 = arith.constant 0 : i32
    %c0_i32_1 = arith.constant 0 : i32
    return %c0_i32, %c0_i32_0 : i32, i32
  }
  func.func @transform_18(%arg0: i32) -> (i32, i32) {
    %c0_i32 = arith.constant 0 : i32
    %c0_i32_0 = arith.constant 0 : i32
    %c0_i32_1 = arith.constant 0 : i32
    return %c0_i32, %c0_i32_0 : i32, i32
  }
  func.func @transform_19(%arg0: i32) -> (i32, i32, i32) {
    %c0_i32 = arith.constant 0 : i32
    %c0_i32_0 = arith.constant 0 : i32
    %c0_i32_1 = arith.constant 0 : i32
    return %arg0, %c0_i32, %c0_i32_0 : i32, i32, i32
  }
}

</mosaic_0001>

<bundles_post_ra>
// kernel: tpu_custom_call.1
= control target key start
LH: loop header
LB: loop body
LE: loop exit
PB: predicated region body
PF: predicated region fallthrough
CT: control target
= control target key end

     0   :  { %s2853_s0 = inlined_call_operand.hbm [shape: bf16[1,32,32], index: 0, kind: input, shape index: {}]   ;;  %s2854_s1 = inlined_call_operand.vmem [shape: f32[1,32,8], index: 1, kind: input, shape index: {}]   ;;  %s2855_s2 = inlined_call_operand.vmem [shape: f32[1,32,4], index: 2, kind: input, shape index: {}]   ;;  %s2856_s3 = inlined_call_operand.hbm [shape: f32[8,128], index: 3, kind: input, shape index: {}]   ;;  %s2857_s4 = inlined_call_operand.vmem [shape: f32[1,128], index: 4, kind: input, shape index: {}]   ;;  %s2858_s5 = inlined_call_operand.hbm [shape: f32[128,128], index: 5, kind: input, shape index: {}]   ;;  %s2859_s6 = inlined_call_operand.vmem [shape: f32[1,128], index: 6, kind: input, shape index: {}]   ;;  %s2860_s7 = inlined_call_operand.vmem [shape: f32[1,128], index: 7, kind: input, shape index: {}]   ;;  %s2861_s8 = inlined_call_operand.vmem [shape: f32[1,128], index: 8, kind: input, shape index: {}]   ;;  %s2862_s9 = inlined_call_operand.hbm [shape: f32[128,128], index: 9, kind: input, shape index: {}]   ;;  %s2863_s10 = inlined_call_operand.hbm [shape: f32[1,128], index: 10, kind: input, shape index: {}]   ;;  %s2864_s11 = inlined_call_operand.hbm [shape: f32[128,128], index: 11, kind: input, shape index: {}]   ;;  %s2865_s12 = inlined_call_operand.hbm [shape: f32[1,128], index: 12, kind: input, shape index: {}]   ;;  %s2866_s13 = inlined_call_operand.hbm [shape: f32[1,128], index: 13, kind: input, shape index: {}]   ;;  %s2867_s14 = inlined_call_operand.hbm [shape: f32[1,128], index: 14, kind: input, shape index: {}]   ;;  %s2868_s15 = inlined_call_operand.vmem [shape: f32[128,128], index: 15, kind: input, shape index: {}]   ;;  %s2869_s16 = inlined_call_operand.vmem [shape: f32[1,128], index: 16, kind: input, shape index: {}]   ;;  %s2870_s17 = inlined_call_operand.hbm [shape: f32[128,128], index: 17, kind: input, shape index: {}]   ;;  %s2871_s18 = inlined_call_operand.vmem [shape: f32[1,128], index: 18, kind: input, shape index: {}]   ;;  %s2872_s19 = inlined_call_operand.hbm [shape: f32[1,4,384], index: 19, kind: output, shape index: {}]  }
   0x1   :  { %2879 = sst [smem:[#allocation27_spill]] %s2853_s0 }
   0x2   :  { %2880 = sst [smem:[#allocation28_spill]] %s2854_s1 }
   0x3   :  { %2881 = sst [smem:[#allocation29_spill]] %s2855_s2 }
   0x4   :  { %2882 = sst [smem:[#allocation30_spill]] %s2856_s3 }
   0x5   :  { %24 = vsyncpa [#allocation3], 0 }
   0x6   :  { %25 = vsyncpa [#allocation6], 0 }
   0x7   :  { %26 = vsyncpa [#allocation9], 0 }
   0x8   :  { %27 = vsyncpa [#allocation12], 0 }
   0x9   :  { %28 = vsyncpa [#allocation15], 0 }
   0xa   :  { %29 = vsyncpa [#allocation18], 0 }
   0xb   :  { %30 = vsyncpa [#allocation4], 0  ;;  %s2378_s0 = smov [#allocation5]   ;;  %s2883_s1 = sld [smem:[#allocation30_spill]] }
   0xc   :  { %s53_s30 = sshll.u32 %s2378_s0, 4  ;;  %s54_s30 = int_to_ptr.vmem [resolvable:$true] %s53_s30 }
  0x11   :  { %s2122_s22 = scalar_lea.hbm %s2883_s1, 128 }
  0x12   :  { %p2123_p0 = scmp.ne.s32.totalorder %s2883_s1, %s2122_s22  ;;  %p2126_p1 = scmp.lt.u32.totalorder %s2122_s22, %s2883_s1 }
  0x14   :  { %p2128_p2 = pnand %p2126_p1, %p2123_p0 }
  0x16   :  { %2131 = shalt.err (!%p2128_p2)
}
  0x17   :  { %s2132_s3 = scalar_lea.vmem %s54_s30, 128  ;;  %p2137_p4 = scmp.lt.s32.totalorder %s54_s30, %s54_s30 }
  0x18   :  { %p2133_p3 = scmp.ne.s32.totalorder %s54_s30, %s2132_s3  ;;  %p2138_p5 = scmp.lt.s32.totalorder %s2132_s3, %s2132_s3 }
  0x1a   :  { %p2139_p6 = por %p2138_p5, %p2137_p4 }
  0x1c   :  { %p2140_p7 = pnand %p2139_p6, %p2133_p3 }
  0x1e   :  { %2143 = shalt.err (!%p2140_p7)
}
  0x1f   :  { %56 = dma.hbm_to_vmem [thread:$0]  %s2883_s1, 128, %s54_s30, [#allocation6]  }
  0x20   :  { %s2379_s28 = smov [#allocation8]   ;;  %s2380_s0 = smov [#allocation11]  }
  0x21   :  { %s82_s29 = sshll.u32 %s2379_s28, 4  ;;  %s104_s20 = sshll.u32 %s2380_s0, 4  ;;  %s83_s29 = int_to_ptr.vmem [resolvable:$true] %s82_s29  ;;  %s105_s20 = int_to_ptr.vmem [resolvable:$true] %s104_s20 }
  0x22   :  { %s2144_s2 = scalar_lea.hbm %s2862_s9, 2048 }
  0x23   :  { %p2145_p8 = scmp.ne.s32.totalorder %s2862_s9, %s2144_s2  ;;  %p2148_p9 = scmp.lt.u32.totalorder %s2144_s2, %s2862_s9 }
  0x25   :  { %p2150_p10 = pnand %p2148_p9, %p2145_p8 }
  0x27   :  { %2153 = shalt.err (!%p2150_p10)
}
  0x28   :  { %s2154_s30 = scalar_lea.vmem %s83_s29, 2048  ;;  %p2159_p12 = scmp.lt.s32.totalorder %s83_s29, %s83_s29 }
  0x29   :  { %p2155_p11 = scmp.ne.s32.totalorder %s83_s29, %s2154_s30  ;;  %p2160_p13 = scmp.lt.s32.totalorder %s2154_s30, %s2154_s30 }
  0x2b   :  { %p2161_p0 = por %p2160_p13, %p2159_p12 }
  0x2d   :  { %p2162_p1 = pnand %p2161_p0, %p2155_p11 }
  0x2f   :  { %2165 = shalt.err (!%p2162_p1)
}
  0x30   :  { %s2877_s1 = smov 128   ;;  %s2382_s26 = smov 8  }
  0x31   :  { %88 = dma.hbm_to_vmem [thread:$0]  %s2862_s9, 2048, %s83_s29, [#allocation9], %s2877_s1, %s2877_s1, %s2382_s26  }
  0x32   :  { %s2166_s22 = scalar_lea.hbm %s2864_s11, 2048 }
  0x33   :  { %p2167_p2 = scmp.ne.s32.totalorder %s2864_s11, %s2166_s22  ;;  %p2170_p3 = scmp.lt.u32.totalorder %s2166_s22, %s2864_s11 }
  0x35   :  { %p2172_p4 = pnand %p2170_p3, %p2167_p2 }
  0x37   :  { %2175 = shalt.err (!%p2172_p4)
}
  0x38   :  { %s2176_s3 = scalar_lea.vmem %s105_s20, 2048  ;;  %p2181_p6 = scmp.lt.s32.totalorder %s105_s20, %s105_s20 }
  0x39   :  { %p2177_p5 = scmp.ne.s32.totalorder %s105_s20, %s2176_s3  ;;  %p2182_p7 = scmp.lt.s32.totalorder %s2176_s3, %s2176_s3 }
  0x3b   :  { %p2183_p8 = por %p2182_p7, %p2181_p6 }
  0x3d   :  { %p2184_p9 = pnand %p2183_p8, %p2177_p5 }
  0x3f   :  { %2187 = shalt.err (!%p2184_p9)
}
  0x40   :  { %110 = dma.hbm_to_vmem [thread:$0]  %s2864_s11, 2048, %s105_s20, [#allocation12], %s2877_s1, %s2877_s1, %s2382_s26  }
  0x41   :  { %s2383_s30 = smov [#allocation14]   ;;  %s2384_s28 = smov [#allocation2]  }
  0x42   :  { %s127_s27 = sshll.u32 %s2383_s30, 4  ;;  %s36_s0 = sshll.u32 %s2384_s28, 4  ;;  %s128_s27 = int_to_ptr.vmem [resolvable:$true] %s127_s27  ;;  %s37_s0 = int_to_ptr.vmem [resolvable:$true] %s36_s0 }
  0x43   :  { %s2188_s2 = scalar_lea.hbm %s2866_s13, 16 }
  0x44   :  { %p2189_p10 = scmp.ne.s32.totalorder %s2866_s13, %s2188_s2  ;;  %p2192_p11 = scmp.lt.u32.totalorder %s2188_s2, %s2866_s13 }
  0x46   :  { %p2194_p12 = pnand %p2192_p11, %p2189_p10 }
  0x48   :  { %2197 = shalt.err (!%p2194_p12)
}
  0x49   :  { %s2198_s11 = scalar_lea.vmem %s128_s27, 16  ;;  %s2202_s20 = scalar_lea.vmem %s128_s27, 32 }
  0x4a   :  { %p2199_p13 = scmp.ne.s32.totalorder %s128_s27, %s2198_s11  ;;  %p2203_p0 = scmp.lt.s32.totalorder %s128_s27, %s128_s27 }
  0x4b   :  { %p2204_p1 = scmp.lt.s32.totalorder %s2202_s20, %s2198_s11 }
  0x4d   :  { %p2205_p2 = por %p2204_p1, %p2203_p0 }
  0x4f   :  { %p2206_p3 = pnand %p2205_p2, %p2199_p13 }
  0x51   :  { %2209 = shalt.err (!%p2206_p3)
}
  0x52   :  { %130 = dma.hbm_to_vmem [thread:$0]  %s2866_s13, 16, %s128_s27, [#allocation15]  }
  0x53   :  { %s2884_s21 = sld [smem:[#allocation27_spill]] }
  0x59   :  { %s2210_s22 = scalar_lea.hbm %s2884_s21, 256 }
  0x5a   :  { %p2211_p4 = scmp.ne.s32.totalorder %s2884_s21, %s2210_s22  ;;  %p2214_p5 = scmp.lt.u32.totalorder %s2210_s22, %s2884_s21 }
  0x5c   :  { %p2216_p6 = pnand %p2214_p5, %p2211_p4 }
  0x5e   :  { %2219 = shalt.err (!%p2216_p6)
}
  0x5f   :  { %s2220_s3 = scalar_lea.vmem %s37_s0, 256  ;;  %p2225_p8 = scmp.lt.s32.totalorder %s37_s0, %s37_s0 }
  0x60   :  { %p2221_p7 = scmp.ne.s32.totalorder %s37_s0, %s2220_s3  ;;  %p2226_p9 = scmp.lt.s32.totalorder %s2220_s3, %s2220_s3 }
  0x62   :  { %p2227_p10 = por %p2226_p9, %p2225_p8 }
  0x64   :  { %p2228_p11 = pnand %p2227_p10, %p2221_p7 }
  0x66   :  { %2231 = shalt.err (!%p2228_p11)
}
  0x67   :  { %s2385_s13 = smov 64   ;;  %s2386_s27 = smov 4  }
  0x68   :  { %42 = dma.hbm_to_vmem [thread:$0]  %s2884_s21, 256, %s37_s0, [#allocation3], %s2385_s13, %s2385_s13, %s2386_s27  }
  0x69   :  { %s2387_s9 = smov [#allocation7]   ;;  %s2388_s30 = smov [#allocation10]  }
  0x6a   :  { %s64_s29 = sshll.u32 %s2387_s9, 4  ;;  %s95_s28 = sshll.u32 %s2388_s30, 4  ;;  %s65_s29 = int_to_ptr.vmem [resolvable:$true] %s64_s29  ;;  %s96_s28 = int_to_ptr.vmem [resolvable:$true] %s95_s28 }
  0x6b   :  { %s2232_s23 = scalar_lea.hbm %s2858_s5, 2048 }
  0x6c   :  { %p2233_p12 = scmp.ne.s32.totalorder %s2858_s5, %s2232_s23  ;;  %p2236_p13 = scmp.lt.u32.totalorder %s2232_s23, %s2858_s5 }
  0x6e   :  { %p2238_p0 = pnand %p2236_p13, %p2233_p12 }
  0x70   :  { %2241 = shalt.err (!%p2238_p0)
}
  0x71   :  { %s2242_s0 = scalar_lea.vmem %s65_s29, 2048  ;;  %p2247_p2 = scmp.lt.s32.totalorder %s65_s29, %s65_s29 }
  0x72   :  { %p2243_p1 = scmp.ne.s32.totalorder %s65_s29, %s2242_s0  ;;  %p2248_p3 = scmp.lt.s32.totalorder %s2242_s0, %s2242_s0 }
  0x74   :  { %p2249_p4 = por %p2248_p3, %p2247_p2 }
  0x76   :  { %p2250_p5 = pnand %p2249_p4, %p2243_p1 }
  0x78   :  { %2253 = shalt.err (!%p2250_p5)
}
  0x79   :  { %s2885_s21 = smov 128   ;;  %s2254_s20 = scalar_lea.hbm %s2863_s10, 16 }
  0x7a   :  { %70 = dma.hbm_to_vmem [thread:$0]  %s2858_s5, 2048, %s65_s29, [#allocation6], %s2885_s21, %s2885_s21, %s2382_s26  }
  0x7b   :  { %p2255_p6 = scmp.ne.s32.totalorder %s2863_s10, %s2254_s20  ;;  %p2258_p7 = scmp.lt.u32.totalorder %s2254_s20, %s2863_s10 }
  0x7d   :  { %p2260_p8 = pnand %p2258_p7, %p2255_p6 }
  0x7f   :  { %2263 = shalt.err (!%p2260_p8)
}
  0x80   :  { %s2264_s23 = scalar_lea.vmem %s96_s28, 16  ;;  %s2268_s24 = scalar_lea.vmem %s96_s28, 32 }
  0x81   :  { %p2265_p9 = scmp.ne.s32.totalorder %s96_s28, %s2264_s23  ;;  %p2269_p10 = scmp.lt.s32.totalorder %s96_s28, %s96_s28 }
  0x82   :  { %p2270_p11 = scmp.lt.s32.totalorder %s2268_s24, %s2264_s23 }
  0x84   :  { %p2271_p12 = por %p2270_p11, %p2269_p10 }
  0x86   :  { %p2272_p13 = pnand %p2271_p12, %p2265_p9 }
  0x88   :  { %2275 = shalt.err (!%p2272_p13)
}
  0x89   :  { %98 = dma.hbm_to_vmem [thread:$0]  %s2863_s10, 16, %s96_s28, [#allocation9]  }
  0x8a   :  { %s2389_s25 = smov [#allocation13]   ;;  %s2390_s0 = smov [#allocation16]  }
  0x8b   :  { %s117_s3 = sshll.u32 %s2389_s25, 4  ;;  %s137_s13 = sshll.u32 %s2390_s0, 4  ;;  %s118_s3 = int_to_ptr.vmem [resolvable:$true] %s117_s3  ;;  %s138_s13 = int_to_ptr.vmem [resolvable:$true] %s137_s13 }
  0x8c   :  { %s2276_s1 = scalar_lea.hbm %s2865_s12, 16 }
  0x8d   :  { %p2277_p0 = scmp.ne.s32.totalorder %s2865_s12, %s2276_s1  ;;  %p2280_p1 = scmp.lt.u32.totalorder %s2276_s1, %s2865_s12 }
  0x8f   :  { %p2282_p2 = pnand %p2280_p1, %p2277_p0 }
  0x91   :  { %2285 = shalt.err (!%p2282_p2)
}
  0x92   :  { %s2286_s10 = scalar_lea.vmem %s118_s3, 16  ;;  %s2290_s28 = scalar_lea.vmem %s118_s3, 32 }
  0x93   :  { %p2287_p3 = scmp.ne.s32.totalorder %s118_s3, %s2286_s10  ;;  %p2291_p4 = scmp.lt.s32.totalorder %s118_s3, %s118_s3 }
  0x94   :  { %p2292_p5 = scmp.lt.s32.totalorder %s2290_s28, %s2286_s10 }
  0x96   :  { %p2293_p6 = por %p2292_p5, %p2291_p4 }
  0x98   :  { %p2294_p7 = pnand %p2293_p6, %p2287_p3 }
  0x9a   :  { %2297 = shalt.err (!%p2294_p7)
}
  0x9b   :  { %120 = dma.hbm_to_vmem [thread:$0]  %s2865_s12, 16, %s118_s3, [#allocation12]  }
  0x9c   :  { %s2298_s29 = scalar_lea.hbm %s2867_s14, 16 }
  0x9d   :  { %p2299_p8 = scmp.ne.s32.totalorder %s2867_s14, %s2298_s29  ;;  %p2302_p9 = scmp.lt.u32.totalorder %s2298_s29, %s2867_s14 }
  0x9f   :  { %p2304_p10 = pnand %p2302_p9, %p2299_p8 }
  0xa1   :  { %2307 = shalt.err (!%p2304_p10)
}
  0xa2   :  { %s2308_s1 = scalar_lea.vmem %s138_s13, 16  ;;  %s2312_s20 = scalar_lea.vmem %s138_s13, 32 }
  0xa3   :  { %p2309_p11 = scmp.ne.s32.totalorder %s138_s13, %s2308_s1  ;;  %p2313_p12 = scmp.lt.s32.totalorder %s138_s13, %s138_s13 }
  0xa4   :  { %p2314_p13 = scmp.lt.s32.totalorder %s2312_s20, %s2308_s1 }
  0xa6   :  { %p2315_p0 = por %p2314_p13, %p2313_p12 }
  0xa8   :  { %p2316_p1 = pnand %p2315_p0, %p2309_p11 }
  0xaa   :  { %2319 = shalt.err (!%p2316_p1)
}
  0xab   :  { %140 = dma.hbm_to_vmem [thread:$0]  %s2867_s14, 16, %s138_s13, [#allocation15]  }
  0xac   :  { %s2391_s9 = smov [#allocation17]   ;;  %s2320_s28 = scalar_lea.hbm %s2870_s17, 2048 }
  0xad   :  { %s150_s30 = sshll.u32 %s2391_s9, 4  ;;  %p2321_p2 = scmp.ne.s32.totalorder %s2870_s17, %s2320_s28  ;;  %s151_s30 = int_to_ptr.vmem [resolvable:$true] %s150_s30 }
  0xae   :  { %p2324_p3 = scmp.lt.u32.totalorder %s2320_s28, %s2870_s17 }
  0xb0   :  { %p2326_p4 = pnand %p2324_p3, %p2321_p2 }
  0xb2   :  { %2329 = shalt.err (!%p2326_p4)
}
  0xb3   :  { %s2330_s29 = scalar_lea.vmem %s151_s30, 2048  ;;  %p2335_p6 = scmp.lt.s32.totalorder %s151_s30, %s151_s30 }
  0xb4   :  { %p2331_p5 = scmp.ne.s32.totalorder %s151_s30, %s2330_s29  ;;  %p2336_p7 = scmp.lt.s32.totalorder %s2330_s29, %s2330_s29 }
  0xb6   :  { %p2337_p8 = por %p2336_p7, %p2335_p6 }
  0xb8   :  { %p2338_p9 = pnand %p2337_p8, %p2331_p5 }
  0xba   :  { %2341 = shalt.err (!%p2338_p9)
}
  0xbb   :  { %156 = dma.hbm_to_vmem [thread:$0]  %s2870_s17, 2048, %s151_s30, [#allocation18], %s2885_s21, %s2885_s21, %s2382_s26  }
  0xbc   :  { %2364 = dma.done.wait [#allocation3], 256  }
  0xbd   :  { %2365 = vsyncadd [#allocation3], 4294967040 }
  0xbe   :  { %2366 = dma.done.wait [#allocation6], 2176  }
  0xbf   :  { %2367 = vsyncadd [#allocation6], 4294965120 }
  0xc0   :  { %2368 = dma.done.wait [#allocation9], 2064  }
  0xc1   :  { %2369 = vsyncadd [#allocation9], 4294965232 }
  0xc2   :  { %2370 = dma.done.wait [#allocation12], 2064  }
  0xc3   :  { %2371 = vsyncadd [#allocation12], 4294965232 }
  0xc4   :  { %2372 = dma.done.wait [#allocation15], 32  }
  0xc5   :  { %2373 = vsyncadd [#allocation15], 4294967264 }
  0xc6   :  { %2374 = dma.done.wait [#allocation18], 2048  }
  0xc7   :  { %2375 = vsyncadd [#allocation18], 4294965248  ;;  %s2886_s27 = sld [smem:[#allocation28_spill]]  ;;  %vm235_vm0 = vcmask 261120   ;;  %v2645_v6 = vld [vmem:[#allocation2] sm:$0xff]   ;;  %v2649_v7 = vld [vmem:[#allocation2 + $0x8] sm:$0xff]  }
  0xc8   :  { %1636 = vmatprep.mubr.msk.bf16.mxu0 %vm235_vm0, %v2645_v6  ;;  %v202_v8 = vld [vmem:[#allocation5] sm:$0xff]  ;;  %v204_v9 = vld [vmem:[#allocation7] sm:$0xff]  ;;  %v205_v10 = vld [vmem:[#allocation7 + $0x8] sm:$0xff]  ;;  %vm301_vm1 = vcmask 64512   ;;  %s2887_s14 = sld [smem:[#allocation29_spill]]  ;;  %s2394_s17 = smov 127  }
  0xc9   :  { %1640 = vmatprep.subr.mxu1 %v202_v8  ;;  %v1865_v11 = vpack.c.bf16 %v205_v10, %v204_v9  ;;  %v206_v14 = vld [vmem:[#allocation7 + $0x10] sm:$0xff]  ;;  %v207_v15 = vld [vmem:[#allocation7 + $0x18] sm:$0xff]  ;;  %v208_v22 = vld [vmem:[#allocation7 + $0x20] sm:$0xff]  ;;  %s2395_s26 = smov 1   ;;  %s2397_s21 = smov 2   ;;  %vm2398_vm2 = vmmov 0  }
  0xca   :  { %1641 = vmatpush3.msra.mxu1 %v202_v8  ;;  %v1869_v20 = vpack.c.bf16 %v207_v15, %v206_v14  ;;  %v209_v23 = vld [vmem:[#allocation7 + $0x28] sm:$0xff]  ;;  %v210_v26 = vld [vmem:[#allocation7 + $0x30] sm:$0xff]  ;;  %v211_v27 = vld [vmem:[#allocation7 + $0x38] sm:$0xff]  ;;  %vm1344_vm3 = vcmask 7168   ;;  %vm1349_vm4 = vcmask 15360   ;;  %vm1354_vm5 = vcmask 23552  }
  0xcb   :  { %1866 = vmatprep.subr.bf16.mxu1 %v1865_v11  ;;  %v1873_v25 = vpack.c.bf16 %v209_v23, %v208_v22  ;;  %v1877_v28 = vpack.c.bf16 %v211_v27, %v210_v26  ;;  %v212_v29 = vld [vmem:[#allocation7 + $0x40] sm:$0xff]  ;;  %v213_v30 = vld [vmem:[#allocation7 + $0x48] sm:$0xff]  ;;  %v214_v32 = vld [vmem:[#allocation7 + $0x50] sm:$0xff]  ;;  %s2399_s20 = smov 125   ;;  %s2400_s12 = smov [#allocation19]  }
  0xcc   :  { %v1881_v31 = vpack.c.bf16 %v213_v30, %v212_v29  ;;  %v215_v33 = vld [vmem:[#allocation7 + $0x58] sm:$0xff]  ;;  %v216_v35 = vld [vmem:[#allocation7 + $0x60] sm:$0xff]  ;;  %v217_v36 = vld [vmem:[#allocation7 + $0x68] sm:$0xff]  ;;  %s1470_s3 = sshll.u32 %s2400_s12, 4  ;;  %s1471_s3 = int_to_ptr.vmem [resolvable:$true] %s1470_s3 }
  0xcd   :  { %v198_v0 = vld [vmem:[%s2886_s27] sm:$0xff]  ;;  %v199_v1 = vld [vmem:[%s2886_s27 + $0x8] sm:$0xff]  ;;  %v200_v2 = vld [vmem:[%s2886_s27 + $0x10] sm:$0xff]  ;;  %v1885_v34 = vpack.c.bf16 %v215_v33, %v214_v32  ;;  %v1889_v37 = vpack.c.bf16 %v217_v36, %v216_v35  ;;  %s2342_s9 = scalar_lea.vmem %s1471_s3, 192  ;;  %p2347_p11 = scmp.lt.s32.totalorder %s1471_s3, %s1471_s3 }
  0xce   :  { %v223_v3 = vpack.c.bf16 %v199_v1, %v198_v0  ;;  %v201_v4 = vld [vmem:[%s2886_s27 + $0x18] sm:$0xff]  ;;  %v218_v38 = vld [vmem:[#allocation7 + $0x70] sm:$0xff]  ;;  %v219_v39 = vld [vmem:[#allocation7 + $0x78] sm:$0xff]  ;;  %p2343_p10 = scmp.ne.s32.totalorder %s1471_s3, %s2342_s9  ;;  %p2348_p12 = scmp.lt.s32.totalorder %s2342_s9, %s2342_s9 }
  0xcf   :  { %v224_v5 = vpack.c.bf16 %v201_v4, %v200_v2  ;;  %v1893_v40 = vpack.c.bf16 %v219_v39, %v218_v38  ;;  %v1488_v41 = vld [vmem:[%s2857_s4] ss:$0 sm:$0xff]  ;;  %v518_v15 = vld [vmem:[#allocation8] sm:$0xff]  ;;  %v524_v26 = vld [vmem:[#allocation8 + $0x30] sm:$0xff] }
  0xd0   :  { %1632 = vmatprep.subr.bf16.mxu0 %v223_v3  ;;  %v1493_v54 = vld [vmem:[%s2859_s6] ss:$0 sm:$0xff]  ;;  %v522_v23 = vld [vmem:[#allocation8 + $0x20] sm:$0xff]  ;;  %v525_v27 = vld [vmem:[#allocation8 + $0x38] sm:$0xff]  ;;  %p2349_p13 = por %p2348_p12, %p2347_p11 }
  0xd1   :  { %1633 = vmatpush3.bf16.msra.mxu0 %v223_v3  ;;  %v1494_v58 = vld [vmem:[%s2860_s7] ss:$0 sm:$0xff]  ;;  %v526_v29 = vld [vmem:[#allocation8 + $0x40] sm:$0xff]  ;;  %v528_v32 = vld [vmem:[#allocation8 + $0x50] sm:$0xff] }
  0xd2   :  { %1634 = vmatprep.subr.bf16.mxu0 %v224_v5  ;;  %v1495_v61 = vld [vmem:[%s2861_s8] ss:$0 sm:$0xff]  ;;  %v529_v33 = vld [vmem:[#allocation8 + $0x58] sm:$0xff]  ;;  %v530_v35 = vld [vmem:[#allocation8 + $0x60] sm:$0xff]  ;;  %p2350_p0 = pnand %p2349_p13, %p2343_p10 }
  0xd3   :  { %v527_v30 = vld [vmem:[#allocation8 + $0x48] sm:$0xff]  ;;  %v532_v38 = vld [vmem:[#allocation8 + $0x70] sm:$0xff]  ;;  %v533_v39 = vld [vmem:[#allocation8 + $0x78] sm:$0xff] }
  0xd4   :  { %v531_v36 = vld [vmem:[#allocation8 + $0x68] sm:$0xff] }
  0xd5   :  { %1635 = vmatpush3.bf16.msra.mxu0 %v224_v5 }
  0xd8   :  { %1637 = vmatmul.mubr.msk.bf16.vlgmr.msra.gmra.mrb[0].mxu0 %vm235_vm0, %v2649_v7 }
  0xd9   :  { %1690 = vmatprep.mubr.msk.bf16.mxu0 %vm235_vm0, %v2645_v6 }
 0x1ab   :  { %v1638_v12 = vpop.f32.mrb[0].mxu0 }
 0x1ac   :  { %v276_v13 = vpop.f32.mrb[1].mxu0  ;;  %v293_v21 = vadd.f32 %v1638_v12, %v200_v2 }
 0x1ad   :  { %v291_v16 = vadd.f32 %v276_v13, %v198_v0  ;;  %v1639_v17 = vpop.f32.mrb[2].mxu0 }
 0x1ae   :  { %v279_v18 = vpop.f32.mrb[3].mxu0  ;;  %v294_v24 = vadd.f32 %v1639_v17, %v201_v4 }
 0x1af   :  { %v292_v19 = vadd.f32 %v279_v18, %v199_v1  ;;  %1642 = vmatprep.mubr.msk.f32.mxu1 %vm301_vm1, %v291_v16  ;;  %v519_v16 = vld [vmem:[#allocation8 + $0x8] sm:$0xff] }
 0x1b1   :  { %1643 = vmatmul.mubr.msk.f32.vlgmr.msra.gmra.mrb[0].mxu1 %vm301_vm1, %v292_v19  ;;  %v1897_v19 = vpack.c.bf16 %v519_v16, %v518_v15 }
 0x1b2   :  { %1645 = vmatprep.mubr.msk.f32.mxu1 %vm301_vm1, %v293_v21  ;;  %1868 = vmatpush3.bf16.msra.mxu1 %v1865_v11  ;;  %v521_v21 = vld [vmem:[#allocation8 + $0x18] sm:$0xff] }
 0x1b3   :  { %1870 = vmatprep.subr.bf16.mxu1 %v1869_v20 }
 0x1b5   :  { %1646 = vmatmul.mubr.msk.f32.gmra.mrb[2].mxu1 %vm301_vm1, %v294_v24  ;;  %v523_v24 = vld [vmem:[#allocation8 + $0x28] sm:$0xff] }
 0x1b6   :  { %1872 = vmatpush3.bf16.msra.mxu1 %v1869_v20  ;;  %v520_v20 = vld [vmem:[#allocation8 + $0x10] sm:$0xff] }
 0x1b7   :  { %1874 = vmatprep.subr.bf16.mxu1 %v1873_v25  ;;  %v1901_v22 = vpack.c.bf16 %v521_v21, %v520_v20  ;;  %v825_v20 = vld [vmem:[%s2868_s15 + $0x30] sm:$0xff]  ;;  %v826_v21 = vld [vmem:[%s2868_s15 + $0x38] sm:$0xff] }
 0x1ba   :  { %1876 = vmatpush3.bf16.msra.mxu1 %v1873_v25  ;;  %v1905_v25 = vpack.c.bf16 %v523_v24, %v522_v23  ;;  %v827_v23 = vld [vmem:[%s2868_s15 + $0x40] sm:$0xff]  ;;  %v828_v24 = vld [vmem:[%s2868_s15 + $0x48] sm:$0xff] }
 0x1bb   :  { %1878 = vmatprep.subr.bf16.mxu1 %v1877_v28 }
 0x1be   :  { %1880 = vmatpush3.bf16.msra.mxu1 %v1877_v28  ;;  %v1909_v28 = vpack.c.bf16 %v525_v27, %v524_v26  ;;  %v829_v26 = vld [vmem:[%s2868_s15 + $0x50] sm:$0xff]  ;;  %v830_v27 = vld [vmem:[%s2868_s15 + $0x58] sm:$0xff] }
 0x1bf   :  { %1882 = vmatprep.subr.bf16.mxu1 %v1881_v31 }
 0x1c2   :  { %1884 = vmatpush3.bf16.msra.mxu1 %v1881_v31  ;;  %v1913_v31 = vpack.c.bf16 %v527_v30, %v526_v29  ;;  %v1498_v29 = vld [vmem:[#allocation10] ss:$0 sm:$0xff] }
 0x1c3   :  { %1886 = vmatprep.subr.bf16.mxu1 %v1885_v34 }
 0x1c6   :  { %1888 = vmatpush3.bf16.msra.mxu1 %v1885_v34  ;;  %v1917_v34 = vpack.c.bf16 %v529_v33, %v528_v32 }
 0x1c7   :  { %1890 = vmatprep.subr.bf16.mxu1 %v1889_v37 }
 0x1ca   :  { %1892 = vmatpush3.bf16.msra.mxu1 %v1889_v37  ;;  %v1921_v37 = vpack.c.bf16 %v531_v36, %v530_v35 }
 0x1cb   :  { %1894 = vmatprep.subr.bf16.mxu1 %v1893_v40 }
 0x1ce   :  { %1896 = vmatpush3.bf16.msra.mxu1 %v1893_v40  ;;  %v1925_v40 = vpack.c.bf16 %v533_v39, %v532_v38 }
 0x284   :  { %v1644_v42 = vpop.f32.mrb[0].mxu1 }
 0x285   :  { %v386_v43 = vadd.f32 %v1644_v42, %v1488_v41  ;;  %v380_v44 = vpop.f32.mrb[1].mxu1  ;;  %v536_v42 = vld [vmem:[#allocation11 + $0x8] sm:$0xff] }
 0x286   :  { %v381_v45 = vadd.f32 %v1488_v41, %v380_v44 }
 0x287   :  { %v400_v48 = vmax.f32 %v386_v43, 0.0  ;;  %v537_v43 = vld [vmem:[#allocation11 + $0x10] sm:$0xff] }
 0x288   :  { %v399_v46 = vmax.f32 %v381_v45, 0.0  ;;  %v1647_v47 = vpop.f32.mrb[2].mxu1  ;;  %v538_v45 = vld [vmem:[#allocation11 + $0x18] sm:$0xff] }
 0x289   :  { %v396_v49 = vadd.f32 %v1647_v47, %v1488_v41  ;;  %v390_v50 = vpop.f32.mrb[3].mxu1  ;;  %v539_v47 = vld [vmem:[#allocation11 + $0x20] sm:$0xff] }
 0x28a   :  { %v391_v51 = vadd.f32 %v1488_v41, %v390_v50  ;;  %1680 = vmatprep.mubr.f32.mxu1 %v399_v46  ;;  %v535_v41 = vld [vmem:[#allocation11] sm:$0xff]  ;;  %v1933_v46 = vpack.c.bf16 %v538_v45, %v537_v43  ;;  %v541_v50 = vld [vmem:[#allocation11 + $0x30] sm:$0xff] }
 0x28b   :  { %1681 = vmatmul.mubr.f32.vlgmr.msra.gmra.mrb[4].mxu1 %v400_v48  ;;  %v402_v53 = vmax.f32 %v396_v49, 0.0  ;;  %v1929_v44 = vpack.c.bf16 %v536_v42, %v535_v41  ;;  %v540_v48 = vld [vmem:[#allocation11 + $0x28] sm:$0xff]  ;;  %v833_v45 = vld [vmem:[%s2868_s15 + $0x70] sm:$0xff] }
 0x28c   :  { %v401_v52 = vmax.f32 %v391_v51, 0.0  ;;  %v1937_v49 = vpack.c.bf16 %v540_v48, %v539_v47  ;;  %v542_v51 = vld [vmem:[#allocation11 + $0x38] sm:$0xff]  ;;  %v831_v42 = vld [vmem:[%s2868_s15 + $0x60] sm:$0xff]  ;;  %v832_v43 = vld [vmem:[%s2868_s15 + $0x68] sm:$0xff] }
 0x28d   :  { %1930 = vmatprep.subr.bf16.mxu1 %v1929_v44  ;;  %v931_v48 = vld [vmem:[#allocation17] sm:$0xff] }
 0x28e   :  { %1683 = vmatprep.mubr.f32.mxu1 %v401_v52  ;;  %1932 = vmatpush3.bf16.msra.mxu1 %v1929_v44  ;;  %v1941_v52 = vpack.c.bf16 %v542_v51, %v541_v50  ;;  %v1985_v44 = vpack.c.bf16 %v832_v43, %v831_v42  ;;  %v933_v50 = vld [vmem:[#allocation17 + $0x10] sm:$0xff] }
 0x28f   :  { %1684 = vmatmul.mubr.f32.gmra.mrb[6].mxu1 %v402_v53  ;;  %1934 = vmatprep.subr.bf16.mxu1 %v1933_v46  ;;  %v543_v53 = vld [vmem:[#allocation11 + $0x40] sm:$0xff] }
 0x292   :  { %1936 = vmatpush3.bf16.msra.mxu1 %v1933_v46  ;;  %v834_v46 = vld [vmem:[%s2868_s15 + $0x78] sm:$0xff] }
 0x293   :  { %1938 = vmatprep.subr.bf16.mxu1 %v1937_v49  ;;  %v1989_v47 = vpack.c.bf16 %v834_v46, %v833_v45 }
 0x296   :  { %1940 = vmatpush3.bf16.msra.mxu1 %v1937_v49  ;;  %v932_v49 = vld [vmem:[#allocation17 + $0x8] sm:$0xff] }
 0x297   :  { %1942 = vmatprep.subr.bf16.mxu1 %v1941_v52  ;;  %v1993_v51 = vpack.c.bf16 %v932_v49, %v931_v48 }
 0x29a   :  { %1944 = vmatpush3.bf16.msra.mxu1 %v1941_v52  ;;  %v934_v52 = vld [vmem:[#allocation17 + $0x18] sm:$0xff] }
 0x35e   :  { %v1682_v55 = vpop.f32.mrb[4].mxu1 }
 0x35f   :  { %v481_v56 = vadd.f32 %v1682_v55, %v1493_v54  ;;  %v475_v57 = vpop.f32.mrb[5].mxu1 }
 0x360   :  { %v476_v59 = vadd.f32 %v1493_v54, %v475_v57  ;;  %v546_v57 = vld [vmem:[#allocation11 + $0x58] sm:$0xff] }
 0x361   :  { %v495_v60 = vmax.f32 %v481_v56, 0.0  ;;  %v545_v56 = vld [vmem:[#allocation11 + $0x50] sm:$0xff] }
 0x362   :  { %v494_v62 = vmax.f32 %v476_v59, 0.0  ;;  %v1685_v63 = vpop.f32.mrb[6].mxu1  ;;  %v547_v59 = vld [vmem:[#allocation11 + $0x60] sm:$0xff] }
 0x363   :  { %v505_v0 = vmul.f32 %v1494_v58, %v495_v60  ;;  %v491_v1 = vadd.f32 %v1685_v63, %v1493_v54  ;;  %v485_v2 = vpop.f32.mrb[7].mxu1  ;;  %v548_v60 = vld [vmem:[#allocation11 + $0x68] sm:$0xff] }
 0x364   :  { %v504_v3 = vmul.f32 %v1494_v58, %v494_v62  ;;  %v486_v4 = vadd.f32 %v1493_v54, %v485_v2  ;;  %v544_v54 = vld [vmem:[#allocation11 + $0x48] sm:$0xff] }
 0x365   :  { %v2671_v5 = vadd.f32 %v1495_v61, %v505_v0  ;;  %v497_v8 = vmax.f32 %v491_v1, 0.0  ;;  %v1945_v55 = vpack.c.bf16 %v544_v54, %v543_v53  ;;  %v1997_v53 = vpack.c.bf16 %v934_v52, %v933_v50  ;;  %v935_v54 = vld [vmem:[#allocation17 + $0x20] sm:$0xff] }
 0x366   :  { %v2673_v9 = vadd.f32 %v1495_v61, %v504_v3  ;;  %v496_v10 = vmax.f32 %v486_v4, 0.0 }
 0x367   :  { %v507_v11 = vmul.f32 %v1494_v58, %v497_v8  ;;  %1946 = vmatprep.subr.bf16.mxu1 %v1945_v55 }
 0x368   :  { %v506_v12 = vmul.f32 %v1494_v58, %v496_v10  ;;  %v554_v13 = vpack.c.bf16 %v2671_v5, %v2673_v9  ;;  %v1949_v58 = vpack.c.bf16 %v546_v57, %v545_v56  ;;  %1948 = vmatpush3.bf16.msra.mxu1 %v1945_v55  ;;  %v549_v10 = vld [vmem:[#allocation11 + $0x70] sm:$0xff] }
 0x369   :  { %v2677_v14 = vadd.f32 %v1495_v61, %v507_v11  ;;  %v550_v11 = vld [vmem:[#allocation11 + $0x78] sm:$0xff]  ;;  %v936_v55 = vld [vmem:[#allocation17 + $0x28] sm:$0xff] }
 0x36a   :  { %v2679_v17 = vadd.f32 %v1495_v61, %v506_v12  ;;  %1686 = vmatprep.subr.bf16.mxu0 %v554_v13  ;;  %1950 = vmatprep.subr.bf16.mxu1 %v1949_v58  ;;  %v1953_v61 = vpack.c.bf16 %v548_v60, %v547_v59  ;;  %v1957_v12 = vpack.c.bf16 %v550_v11, %v549_v10  ;;  %v937_v57 = vld [vmem:[#allocation17 + $0x30] sm:$0xff]  ;;  %v1499_v60 = vld [vmem:[#allocation13] ss:$0 sm:$0xff] }
 0x36b   :  { %1687 = vmatpush3.bf16.msra.mxu0 %v554_v13  ;;  %v821_v13 = vld [vmem:[%s2868_s15 + $0x10] sm:$0xff]  ;;  %v2001_v56 = vpack.c.bf16 %v936_v55, %v935_v54 }
 0x36c   :  { %v555_v18 = vpack.c.bf16 %v2677_v14, %v2679_v17  ;;  %1952 = vmatpush3.bf16.msra.mxu1 %v1949_v58  ;;  %v938_v58 = vld [vmem:[#allocation17 + $0x38] sm:$0xff] }
 0x36d   :  { %1954 = vmatprep.subr.bf16.mxu1 %v1953_v61  ;;  %v2005_v59 = vpack.c.bf16 %v938_v58, %v937_v57 }
 0x36e   :  { %1688 = vmatprep.subr.bf16.mxu0 %v555_v18 }
 0x36f   :  { %1689 = vmatpush3.bf16.msra.mxu0 %v555_v18  ;;  %v824_v18 = vld [vmem:[%s2868_s15 + $0x28] sm:$0xff] }
 0x370   :  { %1898 = vmatprep.subr.bf16.mxu0 %v1897_v19  ;;  %1956 = vmatpush3.bf16.msra.mxu1 %v1953_v61 }
 0x371   :  { %1958 = vmatprep.subr.bf16.mxu1 %v1957_v12 }
 0x372   :  { %1691 = vmatmul.mubr.msk.bf16.vlgmr.msra.gmra.mrb[4].mxu0 %vm235_vm0, %v2649_v7 }
 0x373   :  { %1900 = vmatpush3.bf16.msra.mxu0 %v1897_v19 }
 0x374   :  { %1902 = vmatprep.subr.bf16.mxu0 %v1901_v22  ;;  %1960 = vmatpush3.bf16.msra.mxu1 %v1957_v12 }
 0x375   :  { %1994 = vmatprep.subr.bf16.mxu1 %v1993_v51 }
 0x377   :  { %1904 = vmatpush3.bf16.msra.mxu0 %v1901_v22  ;;  %v1973_v22 = vpack.c.bf16 %v826_v21, %v825_v20 }
 0x378   :  { %1906 = vmatprep.subr.bf16.mxu0 %v1905_v25 }
 0x37b   :  { %1908 = vmatpush3.bf16.msra.mxu0 %v1905_v25  ;;  %v1977_v25 = vpack.c.bf16 %v828_v24, %v827_v23  ;;  %v940_v23 = vld [vmem:[#allocation17 + $0x48] sm:$0xff] }
 0x37c   :  { %1910 = vmatprep.subr.bf16.mxu0 %v1909_v28 }
 0x37f   :  { %1912 = vmatpush3.bf16.msra.mxu0 %v1909_v28  ;;  %v1981_v28 = vpack.c.bf16 %v830_v27, %v829_v26  ;;  %v942_v26 = vld [vmem:[#allocation17 + $0x58] sm:$0xff] }
 0x380   :  { %1914 = vmatprep.subr.bf16.mxu0 %v1913_v31 }
 0x383   :  { %1916 = vmatpush3.bf16.msra.mxu0 %v1913_v31 }
 0x384   :  { %1918 = vmatprep.subr.bf16.mxu0 %v1917_v34 }
 0x387   :  { %1920 = vmatpush3.bf16.msra.mxu0 %v1917_v34 }
 0x388   :  { %1922 = vmatprep.subr.bf16.mxu0 %v1921_v37 }
 0x38b   :  { %1924 = vmatpush3.bf16.msra.mxu0 %v1921_v37 }
 0x38c   :  { %1926 = vmatprep.subr.bf16.mxu0 %v1925_v40 }
 0x38f   :  { %1928 = vmatpush3.bf16.msra.mxu0 %v1925_v40 }
 0x445   :  { %v1692_v62 = vpop.f32.mrb[4].mxu0 }
 0x446   :  { %v590_v63 = vpop.f32.mrb[5].mxu0  ;;  %v607_v4 = vadd.f32 %v1692_v62, %v2679_v17  ;;  %v823_v17 = vld [vmem:[%s2868_s15 + $0x20] sm:$0xff] }
 0x447   :  { %v605_v0 = vadd.f32 %v590_v63, %v2673_v9  ;;  %v1693_v1 = vpop.f32.mrb[6].mxu0  ;;  %v819_v9 = vld [vmem:[%s2868_s15] sm:$0xff]  ;;  %v1969_v19 = vpack.c.bf16 %v824_v18, %v823_v17 }
 0x448   :  { %v593_v2 = vpop.f32.mrb[7].mxu0  ;;  %v608_v8 = vadd.f32 %v1693_v1, %v2677_v14  ;;  %v822_v14 = vld [vmem:[%s2868_s15 + $0x18] sm:$0xff] }
 0x449   :  { %v606_v3 = vadd.f32 %v593_v2, %v2671_v5  ;;  %1726 = vmatprep.mubr.f32.mxu0 %v605_v0  ;;  %v820_v5 = vld [vmem:[%s2868_s15 + $0x8] sm:$0xff]  ;;  %v1965_v16 = vpack.c.bf16 %v822_v14, %v821_v13  ;;  %v1500_v0 = vld [vmem:[#allocation14] ss:$0 sm:$0xff] }
 0x44a   :  { %v1961_v15 = vpack.c.bf16 %v820_v5, %v819_v9 }
 0x44b   :  { %1727 = vmatmul.mubr.f32.vlgmr.msra.gmra.mrb[8].mxu0 %v606_v3  ;;  %v1501_v3 = vld [vmem:[#allocation16] ss:$0 sm:$0xff] }
 0x44c   :  { %1729 = vmatprep.mubr.f32.mxu0 %v607_v4  ;;  %1962 = vmatprep.subr.bf16.mxu0 %v1961_v15 }
 0x44d   :  { %1964 = vmatpush3.bf16.msra.mxu0 %v1961_v15 }
 0x44e   :  { %1966 = vmatprep.subr.bf16.mxu0 %v1965_v16 }
 0x44f   :  { %1730 = vmatmul.mubr.f32.gmra.mrb[10].mxu0 %v608_v8 }
 0x451   :  { %1968 = vmatpush3.bf16.msra.mxu0 %v1965_v16 }
 0x452   :  { %1970 = vmatprep.subr.bf16.mxu0 %v1969_v19 }
 0x455   :  { %1972 = vmatpush3.bf16.msra.mxu0 %v1969_v19 }
 0x456   :  { %1974 = vmatprep.subr.bf16.mxu0 %v1973_v22 }
 0x459   :  { %1976 = vmatpush3.bf16.msra.mxu0 %v1973_v22  ;;  %v939_v22 = vld [vmem:[#allocation17 + $0x40] sm:$0xff] }
 0x45a   :  { %1978 = vmatprep.subr.bf16.mxu0 %v1977_v25  ;;  %v2009_v24 = vpack.c.bf16 %v940_v23, %v939_v22 }
 0x45d   :  { %1980 = vmatpush3.bf16.msra.mxu0 %v1977_v25  ;;  %v941_v25 = vld [vmem:[#allocation17 + $0x50] sm:$0xff] }
 0x45e   :  { %1982 = vmatprep.subr.bf16.mxu0 %v1981_v28  ;;  %v2013_v27 = vpack.c.bf16 %v942_v26, %v941_v25 }
 0x461   :  { %1984 = vmatpush3.bf16.msra.mxu0 %v1981_v28  ;;  %v943_v28 = vld [vmem:[#allocation17 + $0x60] sm:$0xff] }
 0x462   :  { %1986 = vmatprep.subr.bf16.mxu0 %v1985_v44 }
 0x465   :  { %1988 = vmatpush3.bf16.msra.mxu0 %v1985_v44 }
 0x466   :  { %1990 = vmatprep.subr.bf16.mxu0 %v1989_v47 }
 0x469   :  { %1992 = vmatpush3.bf16.msra.mxu0 %v1989_v47  ;;  %v1503_v47 = vld [vmem:[%s2871_s18] ss:$0 sm:$0xff] }
 0x51e   :  { %v1728_v30 = vpop.f32.mrb[8].mxu0 }
 0x51f   :  { %v687_v31 = vadd.f32 %v1728_v30, %v1498_v29  ;;  %v681_v32 = vpop.f32.mrb[9].mxu0 }
 0x520   :  { %v682_v33 = vadd.f32 %v1498_v29, %v681_v32  ;;  %v946_v32 = vld [vmem:[#allocation17 + $0x78] sm:$0xff] }
 0x521   :  { %v701_v36 = vmax.f32 %v687_v31, 0.0  ;;  %v945_v31 = vld [vmem:[#allocation17 + $0x70] sm:$0xff] }
 0x522   :  { %v700_v34 = vmax.f32 %v682_v33, 0.0  ;;  %v1731_v35 = vpop.f32.mrb[10].mxu0  ;;  %v2021_v33 = vpack.c.bf16 %v946_v32, %v945_v31  ;;  %v197_v31 = vld [vmem:[%s2887_s14 + $0x18] sm:$0xff] }
 0x523   :  { %v697_v37 = vadd.f32 %v1731_v35, %v1498_v29  ;;  %v691_v38 = vpop.f32.mrb[11].mxu0 }
 0x524   :  { %v692_v39 = vadd.f32 %v1498_v29, %v691_v38  ;;  %1764 = vmatprep.mubr.f32.mxu1 %v700_v34  ;;  %v944_v29 = vld [vmem:[#allocation17 + $0x68] sm:$0xff]  ;;  %v1502_v34 = vld [vmem:[%s2869_s16] ss:$0 sm:$0xff] }
 0x525   :  { %1765 = vmatmul.mubr.f32.vlgmr.msra.gmra.mrb[8].mxu1 %v701_v36  ;;  %v703_v41 = vmax.f32 %v697_v37, 0.0  ;;  %v2017_v30 = vpack.c.bf16 %v944_v29, %v943_v28  ;;  %v194_v28 = vld [vmem:[%s2887_s14] sm:$0xff]  ;;  %v195_v29 = vld [vmem:[%s2887_s14 + $0x8] sm:$0xff] }
 0x526   :  { %v702_v40 = vmax.f32 %v692_v39, 0.0  ;;  %1996 = vmatpush3.bf16.msra.mxu1 %v1993_v51 }
 0x527   :  { %1998 = vmatprep.subr.bf16.mxu1 %v1997_v53 }
 0x528   :  { %1767 = vmatprep.mubr.f32.mxu1 %v702_v40 }
 0x529   :  { %1768 = vmatmul.mubr.f32.gmra.mrb[10].mxu1 %v703_v41 }
 0x52a   :  { %2000 = vmatpush3.bf16.msra.mxu1 %v1997_v53 }
 0x52b   :  { %2002 = vmatprep.subr.bf16.mxu1 %v2001_v56 }
 0x52e   :  { %2004 = vmatpush3.bf16.msra.mxu1 %v2001_v56 }
 0x52f   :  { %2006 = vmatprep.subr.bf16.mxu1 %v2005_v59 }
 0x532   :  { %2008 = vmatpush3.bf16.msra.mxu1 %v2005_v59 }
 0x533   :  { %2010 = vmatprep.subr.bf16.mxu1 %v2009_v24 }
 0x536   :  { %2012 = vmatpush3.bf16.msra.mxu1 %v2009_v24 }
 0x537   :  { %2014 = vmatprep.subr.bf16.mxu1 %v2013_v27 }
 0x53a   :  { %2016 = vmatpush3.bf16.msra.mxu1 %v2013_v27  ;;  %v2393_v27 = vmov 0.0  }
 0x53b   :  { %2018 = vmatprep.subr.bf16.mxu1 %v2017_v30 }
 0x53e   :  { %2020 = vmatpush3.bf16.msra.mxu1 %v2017_v30  ;;  %v196_v30 = vld [vmem:[%s2887_s14 + $0x10] sm:$0xff] }
 0x53f   :  { %2022 = vmatprep.subr.bf16.mxu1 %v2021_v33 }
 0x542   :  { %2024 = vmatpush3.bf16.msra.mxu1 %v2021_v33 }
 0x5f8   :  { %v1766_v61 = vpop.f32.mrb[8].mxu1 }
 0x5f9   :  { %v782_v62 = vadd.f32 %v1766_v61, %v1499_v60  ;;  %v776_v63 = vpop.f32.mrb[9].mxu1 }
 0x5fa   :  { %v777_v1 = vadd.f32 %v1499_v60, %v776_v63 }
 0x5fb   :  { %v796_v2 = vmax.f32 %v782_v62, 0.0 }
 0x5fc   :  { %v795_v4 = vmax.f32 %v777_v1, 0.0  ;;  %v1769_v8 = vpop.f32.mrb[10].mxu1 }
 0x5fd   :  { %v806_v10 = vmul.f32 %v1500_v0, %v796_v2  ;;  %v792_v11 = vadd.f32 %v1769_v8, %v1499_v60  ;;  %v786_v12 = vpop.f32.mrb[11].mxu1 }
 0x5fe   :  { %v805_v9 = vmul.f32 %v1500_v0, %v795_v4  ;;  %v787_v5 = vadd.f32 %v1499_v60, %v786_v12  ;;  %v2392_v12 = vmov 0  }
 0x5ff   :  { %v2737_v13 = vadd.f32 %v1501_v3, %v806_v10  ;;  %v798_v15 = vmax.f32 %v792_v11, 0.0  ;;  %2062 = vset.pattern.permute.xlu0 %v2392_v12  ;;  %2063 = vset.pattern.permute.xlu1 %v2392_v12 }
 0x600   :  { %v797_v14 = vmax.f32 %v787_v5, 0.0  ;;  %v2739_v16 = vadd.f32 %v1501_v3, %v805_v9 }
 0x601   :  { %v808_v17 = vmul.f32 %v1500_v0, %v798_v15 }
 0x602   :  { %v807_v18 = vmul.f32 %v1500_v0, %v797_v14  ;;  %1802 = vmatprep.mubr.f32.mxu0 %v2739_v16  ;;  %v2025_v19 = vpack.c.bf16 %v2737_v13, %v2739_v16 }
 0x603   :  { %1803 = vmatmul.mubr.f32.vlgmr.msra.gmra.mrb[12].mxu0 %v2737_v13  ;;  %v2747_v21 = vadd.f32 %v1501_v3, %v808_v17 }
 0x604   :  { %2026 = vmatprep.subr.bf16.mxu0 %v2025_v19  ;;  %v2745_v20 = vadd.f32 %v1501_v3, %v807_v18 }
 0x606   :  { %1805 = vmatprep.mubr.f32.mxu0 %v2745_v20 }
 0x607   :  { %1806 = vmatmul.mubr.f32.gmra.mrb[14].mxu0 %v2747_v21 }
 0x608   :  { %1198 = vmatprep.mubr.f32.mxu0 %v2393_v27 }
 0x6d6   :  { %v1804_v35 = vpop.f32.mrb[12].mxu0 }
 0x6d7   :  { %v914_v36 = vadd.f32 %v1804_v35, %v1502_v34  ;;  %v908_v37 = vpop.f32.mrb[13].mxu0 }
 0x6d8   :  { %v909_v38 = vadd.f32 %v1502_v34, %v908_v37 }
 0x6da   :  { %2096 = vtanh.f32 %v909_v38  ;;  %v1807_v39 = vpop.f32.mrb[14].mxu0  ;;  %v2029_v38 = vpack.c.bf16 %v2747_v21, %v2745_v20 }
 0x6db   :  { %2098 = vtanh.f32 %v914_v36  ;;  %v924_v40 = vadd.f32 %v1807_v39, %v1502_v34  ;;  %v918_v41 = vpop.f32.mrb[15].mxu0 }
 0x6dc   :  { %v919_v42 = vadd.f32 %v1502_v34, %v918_v41 }
 0x6de   :  { %2100 = vtanh.f32 %v919_v42 }
 0x6df   :  { %2102 = vtanh.f32 %v924_v40 }
 0x6e4   :  { %v2097_v43 = vpop.eup %2096 }
 0x6e5   :  { %v2099_v44 = vpop.eup %2098  ;;  %1840 = vmatprep.mubr.f32.mxu1 %v2097_v43 }
 0x6e6   :  { %1841 = vmatmul.mubr.f32.vlgmr.msra.gmra.mrb[12].mxu1 %v2099_v44 }
 0x6e8   :  { %v2101_v45 = vpop.eup %2100 }
 0x6e9   :  { %v2103_v46 = vpop.eup %2102  ;;  %1843 = vmatprep.mubr.f32.mxu1 %v2101_v45 }
 0x6ea   :  { %1844 = vmatmul.mubr.f32.gmra.mrb[14].mxu1 %v2103_v46 }
 0x7b9   :  { %v1842_v48 = vpop.f32.mrb[12].mxu1 }
 0x7ba   :  { %v1020_v49 = vpop.f32.mrb[13].mxu1  ;;  %v1026_v53 = vadd.f32 %v1842_v48, %v1503_v47 }
 0x7bb   :  { %v1021_v50 = vadd.f32 %v1503_v47, %v1020_v49 }
 0x7bd   :  { %v1845_v51 = vpop.f32.mrb[14].mxu1  ;;  %1039 = vmax.xlane.f32.xlu0 %v1021_v50 }
 0x7be   :  { %v1030_v52 = vpop.f32.mrb[15].mxu1  ;;  %v1036_v55 = vadd.f32 %v1845_v51, %v1503_v47 }
 0x7bf   :  { %v1031_v54 = vadd.f32 %v1503_v47, %v1030_v52 }
 0x7c1   :  { %1043 = vmax.xlane.f32.xlu1 %v1031_v54  ;;  %1041 = vmax.xlane.f32.xlu0 %v1026_v53 }
 0x7c5   :  { %1045 = vmax.xlane.f32.xlu1 %v1036_v55 }
 0x84a   :  { %v1040_v56 = vpop.xlane.xlu0 %1039 }
 0x84b   :  { %v1047_v57 = vsub.f32 %v1021_v50, %v1040_v56 }
 0x84d   :  { %v1051_v58 = vmul.f32 1.442695, %v1047_v57 }
 0x84e   :  { %v1044_v59 = vpop.xlane.xlu1 %1043  ;;  %v1042_v60 = vpop.xlane.xlu0 %1041 }
 0x84f   :  { %2104 = vpow2.f32 %v1051_v58  ;;  %v1049_v61 = vsub.f32 %v1031_v54, %v1044_v59  ;;  %v1048_v62 = vsub.f32 %v1026_v53, %v1042_v60 }
 0x851   :  { %v1055_v63 = vmul.f32 1.442695, %v1049_v61  ;;  %v1053_v0 = vmul.f32 1.442695, %v1048_v62 }
 0x852   :  { %v1046_v1 = vpop.xlane.xlu1 %1045 }
 0x853   :  { %2106 = vpow2.f32 %v1055_v63  ;;  %v1050_v2 = vsub.f32 %v1036_v55, %v1046_v1  ;;  %v2396_v55 = vmov 0.0|0.0  }
 0x854   :  { %2108 = vpow2.f32 %v1053_v0 }
 0x855   :  { %v1057_v3 = vmul.f32 1.442695, %v1050_v2 }
 0x857   :  { %2110 = vpow2.f32 %v1057_v3 }
 0x859   :  { %v2105_v4 = vpop.eup %2104 }
 0x85a   :  { %1059 = vadd.xlane.f32.xlu0 %v2105_v4 }
 0x85d   :  { %v2107_v8 = vpop.eup %2106 }
 0x85e   :  { %v2109_v10 = vpop.eup %2108  ;;  %1063 = vadd.xlane.f32.xlu0 %v2107_v8 }
 0x85f   :  { %1061 = vadd.xlane.f32.xlu1 %v2109_v10 }
 0x861   :  { %v2111_v11 = vpop.eup %2110 }
 0x863   :  { %1065 = vadd.xlane.f32.xlu1 %v2111_v11 }
 0x8e7   :  { %v1060_v9 = vpop.xlane.xlu0 %1059 }
 0x8e8   :  { %2112 = vrcp.f32 %v1060_v9 }
 0x8eb   :  { %v1064_v15 = vpop.xlane.xlu0 %1063 }
 0x8ec   :  { %v1062_v5 = vpop.xlane.xlu1 %1061 }
 0x8ed   :  { %2114 = vrcp.f32 %v1062_v5 }
 0x8f0   :  { %v1066_v14 = vpop.xlane.xlu1 %1065 }
 0x8f1   :  { %2116 = vrcp.f32 %v1066_v14 }
 0x8f2   :  { %v2113_v17 = vpop.eup %2112  ;;  %2118 = vrcp.f32 %v1064_v15 }
 0x8f3   :  { %v2757_v18 = vmul.f32 %v2113_v17, %v2105_v4 }
 0x8f5   :  { %1077 = vperm.xlu0 %2062, %v2757_v18  }
 0x8f7   :  { %v2115_v19 = vpop.eup %2114 }
 0x8f8   :  { %v2760_v22 = vmul.f32 %v2115_v19, %v2109_v10 }
 0x8fa   :  { %1082 = vperm.xlu1 %2063, %v2760_v22   ;;  %v1205_v43 = vpack.c.bf16 %v2760_v22, %v2757_v18 }
 0x8fb   :  { %v2117_v23 = vpop.eup %2116 }
 0x8fc   :  { %v2763_v24 = vmul.f32 %v2117_v23, %v2111_v11  ;;  %v2119_v25 = vpop.eup %2118 }
 0x8fd   :  { %v2766_v26 = vmul.f32 %v2119_v25, %v2107_v8 }
 0x8fe   :  { %1092 = vperm.xlu1 %2063, %v2763_v24  }
 0x902   :  { %1087 = vperm.xlu1 %2063, %v2766_v26  }
 0x92b   :  { %1099 = vxpose.xlu1.b32.start [1/4] (short) (narrow) %v194_v28, 8 }
 0x92f   :  { %1100 = vxpose.xlu1.b32.cont [2/4] (short) (narrow) %v195_v29, 8 }
 0x933   :  { %1101 = vxpose.xlu1.b32.cont [3/4] (short) (narrow) %v196_v30, 8 }
 0x937   :  { %1102 = vxpose.xlu1.b32.end [4/4] (short) (narrow) %v197_v31, 8 }
 0x974   :  { %v1078_v32 = vpop.permute.xlu0 %1077 }
 0x975   :  { %v1095_v34 = vmul.f32 %v1078_v32, %v2739_v16 }
 0x979   :  { %v1083_v33 = vpop.permute.xlu1 %1082 }
 0x97a   :  { %v1096_v35 = vmul.f32 %v1083_v33, %v2737_v13  ;;  %v1206_v13 = vpack.c.bf16 %v2763_v24, %v2766_v26 }
 0x97c   :  { %v2027_v36 = vpack.c.bf16 %v1096_v35, %v1095_v34 }
 0x97d   :  { %v1093_v37 = vpop.permute.xlu1 %1092 }
 0x97e   :  { %2028 = vmatpush1.bf16.msra.mxu0 %v2027_v36  ;;  %v1098_v40 = vmul.f32 %v1093_v37, %v2747_v21 }
 0x97f   :  { %2030 = vmatprep.subr.bf16.mxu0 %v2029_v38 }
 0x981   :  { %v1088_v39 = vpop.permute.xlu1 %1087 }
 0x982   :  { %v1097_v41 = vmul.f32 %v1088_v39, %v2745_v20 }
 0x984   :  { %v2031_v42 = vpack.c.bf16 %v1098_v40, %v1097_v41 }
 0x986   :  { %2032 = vmatpush1.bf16.msra.mxu0 %v2031_v42 }
 0x987   :  { %1846 = vmatprep.subr.bf16.mxu0 %v1205_v43 }
 0x9ab   :  { %v2790_v16 = vpop.trf.xlu1 }
 0x9ac   :  { %1504 = vmatmul.mubr.msk.f32.vlgmr.msra.gmra.mrb[16].mxu0 %vm235_vm0, %v2790_v16 }
 0x9ad   :  { %1847 = vmatpush3.bf16.msra.mxu0 %v1205_v43  ;;  %1850 = vmatprep.mubr.msk.bf16.mxu0 %vm235_vm0, %v2645_v6 }
 0x9ae   :  { %1848 = vmatprep.subr.bf16.mxu0 %v1206_v13 }
 0x9b1   :  { %1849 = vmatpush3.bf16.msra.mxu0 %v1206_v13 }
 0x9b2   :  { %2033 = vmatprep.subr.bf16.mxu0 %v2396_v55 }
 0x9b4   :  { %1851 = vmatmul.mubr.msk.bf16.vlgmr.msra.gmra.mrb[20].mxu0 %vm235_vm0, %v2649_v7 }
 0x9b5   :  { %1862 = vmatprep.mubr.msk.f32.mxu0 %vm2398_vm2, %v2393_v27 }
 0xa7f   :  { %v1200_v20 = vpop.f32.mrb[16].mxu0 }
 0xa80   :  { %v1202_v21 = vpop.f32.mrb[17].mxu0 }
 0xa81   :  { %v1460_v44 = vcombine.low %v1200_v20, %v1202_v21 }
 0xa83   :  { %1462 = vst [vmem:[#allocation19] sm:$0xff] %v1460_v44 }
 0xa87   :  { %v1852_v45 = vpop.f32.mrb[20].mxu0 }
 0xa88   :  { %1268 = vrot.lane.b32.xlu0 %v1852_v45, %s2394_s17  ;;  %v1241_v46 = vpop.f32.mrb[21].mxu0  ;;  %v1258_v12 = vmul.f32 %v1852_v45, %v2766_v26 }
 0xa89   :  { %v1853_v47 = vpop.f32.mrb[22].mxu0  ;;  %v1256_v59 = vmul.f32 %v1241_v46, %v2757_v18 }
 0xa8a   :  { %v1244_v48 = vpop.f32.mrb[23].mxu0  ;;  %v1259_v10 = vmul.f32 %v1853_v47, %v2763_v24 }
 0xa8b   :  { %v1257_v56 = vmul.f32 %v1244_v48, %v2760_v22 }
 0xa8c   :  { %1284 = vrot.lane.b32.xlu0 %v1852_v45, %s2395_s26  ;;  %v2089_v9 = vpack.i.bf16 %v1259_v10, %v1258_v12 }
 0xa8d   :  { %v2074_v0 = vpack.i.bf16 %v1257_v56, %v1256_v59 }
 0xa90   :  { %1264 = vrot.lane.b32.xlu0 %v1241_v46, %s2394_s17 }
 0xa94   :  { %1280 = vrot.lane.b32.xlu0 %v1241_v46, %s2395_s26 }
 0xa98   :  { %1270 = vrot.lane.b32.xlu0 %v1853_v47, %s2394_s17 }
 0xa9c   :  { %1266 = vrot.lane.b32.xlu0 %v1244_v48, %s2394_s17 }
 0xaa0   :  { %1282 = vrot.lane.b32.xlu0 %v1244_v48, %s2395_s26 }
 0xaa4   :  { %1286 = vrot.lane.b32.xlu0 %v1853_v47, %s2395_s26 }
 0xafa   :  { %v1269_v6 = vpop.permute.xlu0 %1268 }
 0xafb   :  { %v1278_v2 = vmul.f32 %v1269_v6, %v2766_v26 }
 0xafe   :  { %v1285_v7 = vpop.permute.xlu0 %1284 }
 0xaff   :  { %v1294_v8 = vmul.f32 %v1285_v7, %v2766_v26 }
 0xb02   :  { %v1265_v49 = vpop.permute.xlu0 %1264 }
 0xb03   :  { %v1276_v53 = vmul.f32 %v1265_v49, %v2757_v18 }
 0xb06   :  { %v1281_v50 = vpop.permute.xlu0 %1280 }
 0xb07   :  { %v1292_v60 = vmul.f32 %v1281_v50, %v2757_v18 }
 0xb0a   :  { %v1271_v51 = vpop.permute.xlu0 %1270 }
 0xb0b   :  { %v1279_v62 = vmul.f32 %v1271_v51, %v2763_v24 }
 0xb0d   :  { %v2079_v3 = vpack.i.bf16 %v1279_v62, %v1278_v2 }
 0xb0e   :  { %v1267_v52 = vpop.permute.xlu0 %1266 }
 0xb0f   :  { %v1277_v54 = vmul.f32 %v1267_v52, %v2760_v22 }
 0xb11   :  { %v2064_v57 = vpack.i.bf16 %v1277_v54, %v1276_v53 }
 0xb12   :  { %v1283_v58 = vpop.permute.xlu0 %1282 }
 0xb13   :  { %v1293_v61 = vmul.f32 %v1283_v58, %v2760_v22  ;;  %2065 = vrot.lane.b32.xlu0 %v2064_v57, %s2395_s26 }
 0xb15   :  { %v2069_v63 = vpack.i.bf16 %v1293_v61, %v1292_v60 }
 0xb16   :  { %v1287_v1 = vpop.permute.xlu0 %1286 }
 0xb17   :  { %2070 = vrot.lane.b32.xlu1 %v2069_v63, %s2395_s26  ;;  %2075 = vrot.lane.b32.xlu0 %v2074_v0, %s2397_s21  ;;  %v1295_v4 = vmul.f32 %v1287_v1, %v2763_v24 }
 0xb19   :  { %v2084_v11 = vpack.i.bf16 %v1295_v4, %v1294_v8 }
 0xb1b   :  { %2080 = vrot.lane.b32.xlu0 %v2079_v3, %s2395_s26 }
 0xb1f   :  { %2085 = vrot.lane.b32.xlu0 %v2084_v11, %s2395_s26 }
 0xb23   :  { %2090 = vrot.lane.b32.xlu0 %v2089_v9, %s2397_s21 }
 0xb85   :  { %v2066_v5 = vpop.permute.xlu0 %2065 }
 0xb86   :  { %v2068_v15 = vunpack.i.h.bf16 %v2066_v5  ;;  %v2067_v14 = vunpack.i.l.bf16 %v2066_v5 }
 0xb88   :  { %v1345_v24 = vsel %vm1344_vm3, %v1256_v59, %v2067_v14  ;;  %v1346_v26 = vsel %vm1344_vm3, %v1257_v56, %v2068_v15 }
 0xb89   :  { %v2071_v17 = vpop.permute.xlu1 %2070  ;;  %v2076_v18 = vpop.permute.xlu0 %2075 }
 0xb8a   :  { %v2073_v19 = vunpack.i.h.bf16 %v2071_v17  ;;  %v2072_v22 = vunpack.i.l.bf16 %v2071_v17  ;;  %v2078_v23 = vunpack.i.h.bf16 %v2076_v18  ;;  %v2077_v25 = vunpack.i.l.bf16 %v2076_v18 }
 0xb8c   :  { %v1350_v27 = vsel %vm1349_vm4, %v1345_v24, %v2072_v22  ;;  %v1351_v28 = vsel %vm1349_vm4, %v1346_v26, %v2073_v19 }
 0xb8d   :  { %v1355_v29 = vsel %vm1354_vm5, %v1350_v27, %v2077_v25  ;;  %v1356_v30 = vsel %vm1354_vm5, %v1351_v28, %v2078_v23  ;;  %v2081_v31 = vpop.permute.xlu0 %2080 }
 0xb8e   :  { %v2034_v32 = vpack.c.bf16 %v1356_v30, %v1355_v29  ;;  %v2083_v34 = vunpack.i.h.bf16 %v2081_v31  ;;  %v2082_v35 = vunpack.i.l.bf16 %v2081_v31 }
 0xb90   :  { %2035 = vmatpush3.bf16.msra.mxu0 %v2034_v32  ;;  %v1348_v39 = vsel %vm1344_vm3, %v1259_v10, %v2083_v34  ;;  %v1347_v40 = vsel %vm1344_vm3, %v1258_v12, %v2082_v35 }
 0xb91   :  { %v2086_v33 = vpop.permute.xlu0 %2085  ;;  %2036 = vmatprep.subr.bf16.mxu0 %v2396_v55 }
 0xb92   :  { %v2088_v36 = vunpack.i.h.bf16 %v2086_v33  ;;  %v2087_v37 = vunpack.i.l.bf16 %v2086_v33 }
 0xb94   :  { %v1352_v43 = vsel %vm1349_vm4, %v1347_v40, %v2087_v37  ;;  %v1353_v13 = vsel %vm1349_vm4, %v1348_v39, %v2088_v36 }
 0xb95   :  { %v2091_v38 = vpop.permute.xlu0 %2090 }
 0xb96   :  { %v2093_v41 = vunpack.i.h.bf16 %v2091_v38  ;;  %v2092_v42 = vunpack.i.l.bf16 %v2091_v38 }
 0xb98   :  { %v1357_v20 = vsel %vm1354_vm5, %v1352_v43, %v2092_v42  ;;  %v1358_v21 = vsel %vm1354_vm5, %v1353_v13, %v2093_v41 }
 0xb99   :  { %v2037_v44 = vpack.c.bf16 %v1358_v21, %v1357_v20 }
 0xb9b   :  { %2038 = vmatpush3.bf16.msra.mxu0 %v2037_v44 }
 0xb9e   :  { %1863 = vmatmul.mubr.msk.f32.vlgmr.msra.gmra.mrb[18].mxu0 %vm235_vm0, %v2790_v16 }
 0xc71   :  { %v1425_v45 = vpop.f32.mrb[18].mxu0 }
 0xc72   :  { %v1429_v46 = vand.u32 2147483647, %v1425_v45  ;;  %v1864_v47 = vpop.f32.mrb[19].mxu0 }
 0xc74   :  { %1431 = vrot.lane.b32.xlu0 %v1429_v46, %s2394_s17 }
 0xce6   :  { %v1432_v48 = vpop.permute.xlu0 %1431 }
 0xce7   :  { %v1434_v6 = vadd.f32 %v1432_v48, %v1429_v46 }
 0xce9   :  { %v1435_v7 = vmax.f32 %v1434_v6, 1e-12 }
 0xceb   :  { %2120 = vrcp.f32 %v1435_v7 }
 0xcf5   :  { %v2121_v49 = vpop.eup %2120 }
 0xcf6   :  { %1439 = vrot.lane.b32.xlu0 %v2121_v49, %s2395_s26  ;;  %v1437_v50 = vmul.f32 %v2121_v49, %v1425_v45 }
 0xcf8   :  { %v1508_v16 = vadd.f32 -1.0, %v1437_v50 }
 0xcfa   :  { %v1444_v55 = vmul.f32 %v1508_v16, %v1508_v16 }
 0xd68   :  { %v1440_v51 = vpop.permute.xlu0 %1439 }
 0xd69   :  { %v1442_v52 = vmul.f32 %v1440_v51, %v1425_v45 }
 0xd6b   :  { %v1509_v53 = vadd.f32 -1.0, %v1442_v52 }
 0xd6d   :  { %v1446_v54 = vmul.f32 %v1509_v53, %v1509_v53 }
 0xd6f   :  { %1448 = vrot.lane.b32.xlu0 %v1446_v54, %s2399_s20 }
 0xde1   :  { %v1449_v56 = vpop.permute.xlu0 %1448 }
 0xde2   :  { %v1451_v57 = vadd.f32 %v1449_v56, %v1444_v55 }
 0xde4   :  { %v1452_v58 = vmul.f32 0.5, %v1451_v57 }
 0xde6   :  { %1455 = vperm.xlu0 %2062, %v1452_v58  }
 0xe65   :  { %v1456_v59 = vpop.permute.xlu0 %1455 }
 0xe66   :  { %1463 = vst [vmem:[#allocation19 + $0x8] sm:$0xf] %v1456_v59 }
 0xe67   :  { %2353 = shalt.err (!%p2350_p0)
}
 0xe68   :  { %s2354_s22 = scalar_lea.hbm %s2872_s19, 192 }
 0xe69   :  { %p2355_p1 = scmp.ne.s32.totalorder %s2872_s19, %s2354_s22  ;;  %p2358_p2 = scmp.lt.u32.totalorder %s2354_s22, %s2872_s19 }
 0xe6b   :  { %p2360_p3 = pnand %p2358_p2, %p2355_p1 }
 0xe6d   :  { %2363 = shalt.err (!%p2360_p3)
}
 0xe6e   :  { %1473 = dma.vmem_to_hbm [thread:$0]  %s1471_s3, 192, %s2872_s19, [#allocation4]  }
 0xe6f   :  { %2376 = dma.done.wait [#allocation4], 192  }
 0xe70   :  { %2377 = vsyncadd [#allocation4], 4294967104 }
 0xe71   :  { %1477 = vsyncpa [#allocation3], 1 }
 0xe72   :  { %1478 = vsyncpa [#allocation6], 1 }
 0xe73   :  { %1479 = vsyncpa [#allocation9], 1 }
 0xe74   :  { %1480 = vsyncpa [#allocation12], 1 }
 0xe75   :  { %1481 = vsyncpa [#allocation15], 1 }
 0xe76   :  { %1482 = vsyncpa [#allocation18], 1 }
 0xe77   :  { %1483 = vsyncpa [#allocation4], 1 }

</bundles_post_ra>
